<compile_context>
chip_gen: v5e
topology: v5e:2x2
jax: 0.10.0
libtpu: 0.0.40
codegen_flags: <defaults>
</compile_context>

<pallas_src>
import jax
import jax.numpy as jnp
from jax.experimental import pallas as pl
from jax.experimental.pallas import tpu as pltpu

BATCH = 2
SEQ = 8
INPUT_SIZE = 16
HIDDEN = 32
NUM_LAYERS = 3
OUTPUT_SIZE = 1
GATES = 4 * HIDDEN                     # 128 -> exactly one lane dimension

# ---- packed-parameter row offsets (all multiples of 8 => tile-aligned) ----
_L0_WIH = 0                            # (INPUT_SIZE, 4H)
_L0_WHH = 16                           # (H, 4H)
_L1_WIH = 48                           # (H, 4H)   -- adjacent to _L1_WHH so the
_L1_WHH = 80                           # (H, 4H)      stacked [W_ih;W_hh] is one slab
_L2_WIH = 112
_L2_WHH = 144
_B0 = 176                              # (1, 4H) = b_ih + b_hh, layer 0
_B1 = 184
_B2 = 192
_FC1W = 200                            # (H, 4H)  real cols 0:H//2, rest zero
_FC1B = 232                            # (1, 4H)  real cols 0:H//2
_FC2 = 240                             # (1, 4H)  lanes 0:H//2 = fc2 weight, lane H//2 = fc2 bias
_FC2_BIAS_LANE = HIDDEN // 2
_PACK_ROWS = 248


def _lstm_mlp_kernel(x_ref, p_ref, out_ref, proj0_ref):
    B, H, T = BATCH, HIDDEN, SEQ

    # ---- layer 0: hoisted input projection for ALL timesteps, staged in VMEM ----
    proj0_ref[...] = (
        jnp.dot(x_ref[...], p_ref[_L0_WIH:_L0_WIH + INPUT_SIZE, :],
                preferred_element_type=jnp.float32)
        + p_ref[_B0:_B0 + 1, :])

    whh0 = p_ref[_L0_WHH:_L0_WHH + H, :]          # (H, 4H)
    w1 = p_ref[_L1_WIH:_L1_WIH + 2 * H, :]        # (2H, 4H) stacked [W_ih1; W_hh1]
    w2 = p_ref[_L2_WIH:_L2_WIH + 2 * H, :]        # (2H, 4H) stacked [W_ih2; W_hh2]
    b1 = p_ref[_B1:_B1 + 1, :]
    b2 = p_ref[_B2:_B2 + 1, :]

    def cell(gates, c_prev):
        # g-gate columns of the packed weights/biases are pre-scaled by 2, so a
        # single 128-lane sigmoid yields all four gates via
        # tanh(x) = 2*sigmoid(2x) - 1 (one EUP pass per step instead of two).
        sig = jax.nn.sigmoid(gates)
        i = sig[:, :H]
        f = sig[:, H:2 * H]
        g = 2.0 * sig[:, 2 * H:3 * H] - 1.0
        o = sig[:, 3 * H:]
        c_new = f * c_prev + i * g
        h_new = o * jnp.tanh(c_new)
        return h_new, c_new

    z = jnp.zeros((B, H), jnp.float32)
    h = [z, z, z]
    c = [z, z, z]

    # ---- wavefront over the 3 layers: critical path = T + L - 1 = 10 steps ----
    # Within a wave, layers are processed top-down (2, 1, 0) so each one reads
    # the previous wave's hidden states before they are rebound.
    for w in range(T + NUM_LAYERS - 1):
        if 0 <= w - 2 < T:                        # layer 2, timestep w-2
            gates2 = jnp.dot(jnp.concatenate([h[1], h[2]], axis=1), w2,
                             preferred_element_type=jnp.float32) + b2
            h[2], c[2] = cell(gates2, c[2])
        if 0 <= w - 1 < T:                        # layer 1, timestep w-1
            gates1 = jnp.dot(jnp.concatenate([h[0], h[1]], axis=1), w1,
                             preferred_element_type=jnp.float32) + b1
            h[1], c[1] = cell(gates1, c[1])
        if w < T:                                 # layer 0, timestep w
            gates0 = proj0_ref[w * B:(w + 1) * B, :] + jnp.dot(
                h[0], whh0, preferred_element_type=jnp.float32)
            h[0], c[0] = cell(gates0, c[0])

    # TODO(synk): inter-layer LSTM dropout and self.dropout1 are identity in
    # eval mode, so no RNG is emitted here.

    # ---- head: fc1 -> tanh (zero-padded to 128 lanes), fc2 as VPU mul + lane sum ----
    hid = jnp.tanh(
        jnp.dot(h[2], p_ref[_FC1W:_FC1W + H, :],
                preferred_element_type=jnp.float32)
        + p_ref[_FC1B:_FC1B + 1, :])              # (B, 128); cols >= H//2 are 0

    fc2_row = p_ref[_FC2:_FC2 + 1, :]             # lanes 0:H//2 weight, lane H//2 bias
    out = (jnp.sum(hid * fc2_row, axis=-1, keepdims=True)
           + fc2_row[:, _FC2_BIAS_LANE:_FC2_BIAS_LANE + 1])
    out_ref[...] = out.astype(out_ref.dtype)


def pack_params(params):
    """Pack the 13 pre-transposed parameter arrays into a single (248, 128)
    f32 buffer with 8-row-aligned segments.

    Notes:
      * each LSTM layer takes a single PRE-SUMMED bias (b_ih + b_hh); callers
        with real PyTorch checkpoints must sum the two bias vectors first.
      * the g-gate columns (2H:3H) of W_ih, W_hh and the bias are scaled by 2
        here so the kernel can use tanh(x) = 2*sigmoid(2x) - 1.
    """
    (wih0, whh0, b0, wih1, whh1, b1, wih2, whh2, b2,
     fc1w, fc1b, fc2w, fc2b) = params
    H = HIDDEN

    def scale_g(arr):
        arr = jnp.asarray(arr, jnp.float32)
        return arr.at[:, 2 * H:3 * H].multiply(2.0)

    buf = jnp.zeros((_PACK_ROWS, GATES), jnp.float32)

    def put(b, row, arr):
        arr = jnp.asarray(arr, jnp.float32)
        r, cnum = arr.shape
        return b.at[row:row + r, :cnum].set(arr)

    buf = put(buf, _L0_WIH, scale_g(wih0))
    buf = put(buf, _L0_WHH, scale_g(whh0))
    buf = put(buf, _L1_WIH, scale_g(wih1))
    buf = put(buf, _L1_WHH, scale_g(whh1))
    buf = put(buf, _L2_WIH, scale_g(wih2))
    buf = put(buf, _L2_WHH, scale_g(whh2))
    buf = put(buf, _B0, scale_g(b0))
    buf = put(buf, _B1, scale_g(b1))
    buf = put(buf, _B2, scale_g(b2))
    buf = put(buf, _FC1W, fc1w)
    buf = put(buf, _FC1B, fc1b)
    # fc2: 16 weights in lanes 0:H//2, scalar bias in lane H//2 of one row.
    fc2_row = jnp.zeros((1, GATES), jnp.float32)
    fc2_row = fc2_row.at[0, :H // 2].set(jnp.asarray(fc2w, jnp.float32).reshape(-1))
    fc2_row = fc2_row.at[0, _FC2_BIAS_LANE].set(
        jnp.asarray(fc2b, jnp.float32).reshape(()))
    buf = buf.at[_FC2:_FC2 + 1, :].set(fc2_row)
    return buf


def lstm_arbitrage_forward(x, packed_params):
    """x: (B, T, F) batch-first; packed_params: output of pack_params()."""
    B, T, F = x.shape
    # Time-major flatten so each timestep is a contiguous B-row slab and layer
    # 0's input projection is one lane-dense matmul.
    x_tm = jnp.transpose(x, (1, 0, 2)).reshape(T * B, F)
    vmem = pl.BlockSpec(memory_space=pltpu.MemorySpace.VMEM)
    return pl.pallas_call(
        _lstm_mlp_kernel,
        out_shape=jax.ShapeDtypeStruct((B, OUTPUT_SIZE), jnp.float32),
        in_specs=[vmem, vmem],           # 2 DMAs total (x + packed params)
        out_specs=vmem,
        scratch_shapes=[pltpu.VMEM((T * B, GATES), jnp.float32)],
    )(x_tm, packed_params)


def init_params(key):
    """Deterministic synthetic parameters matching the PyTorch module's init
    scheme (xavier_uniform weight_ih, orthogonal weight_hh, zero LSTM biases,
    default Linear init for fc1/fc2).  Returned already transposed for the
    kernel layout (in_features, out_features)."""
    keys = jax.random.split(key, 10)
    ortho = jax.nn.initializers.orthogonal()
    params = []
    idx = 0
    in_sizes = [INPUT_SIZE, HIDDEN, HIDDEN]
    for layer in range(NUM_LAYERS):
        fan_in = in_sizes[layer]
        limit = (6.0 / (4 * HIDDEN + fan_in)) ** 0.5        # xavier_uniform
        w_ih = jax.random.uniform(keys[idx], (4 * HIDDEN, fan_in),
                                  jnp.float32, -limit, limit); idx += 1
        w_hh = ortho(keys[idx], (4 * HIDDEN, HIDDEN), jnp.float32); idx += 1
        bias = jnp.zeros((1, 4 * HIDDEN), jnp.float32)      # b_ih + b_hh == 0
        params += [w_ih.T, w_hh.T, bias]
    lim1 = 1.0 / (HIDDEN ** 0.5)
    fc1_w = jax.random.uniform(keys[idx], (HIDDEN // 2, HIDDEN),
                               jnp.float32, -lim1, lim1); idx += 1
    fc1_b = jax.random.uniform(keys[idx], (1, HIDDEN // 2),
                               jnp.float32, -lim1, lim1); idx += 1
    lim2 = 1.0 / ((HIDDEN // 2) ** 0.5)
    fc2_w = jax.random.uniform(keys[idx], (OUTPUT_SIZE, HIDDEN // 2),
                               jnp.float32, -lim2, lim2); idx += 1
    fc2_b = jax.random.uniform(keys[idx], (1, OUTPUT_SIZE),
                               jnp.float32, -lim2, lim2); idx += 1
    params += [fc1_w.T, fc1_b, fc2_w.T, fc2_b]
    return params


def reference_forward(x, params):
    """Pure-JAX reference (same math as the PyTorch module, eval mode)."""
    B = x.shape[0]
    seq = x
    for layer in range(NUM_LAYERS):
        wih_t, whh_t, bias = (params[3 * layer], params[3 * layer + 1],
                              params[3 * layer + 2])
        h = jnp.zeros((B, HIDDEN), jnp.float32)
        c = jnp.zeros((B, HIDDEN), jnp.float32)
        outs = []
        for t in range(seq.shape[1]):
            gates = seq[:, t, :] @ wih_t + h @ whh_t + bias
            i = jax.nn.sigmoid(gates[:, :HIDDEN])
            f = jax.nn.sigmoid(gates[:, HIDDEN:2 * HIDDEN])
            g = jnp.tanh(gates[:, 2 * HIDDEN:3 * HIDDEN])
            o = jax.nn.sigmoid(gates[:, 3 * HIDDEN:])
            c = f * c + i * g
            h = o * jnp.tanh(c)
            outs.append(h)
        seq = jnp.stack(outs, axis=1)
    last = seq[:, -1, :]
    hid = jnp.tanh(last @ params[9] + params[10])
    return hid @ params[11] + params[12]


if __name__ == "__main__":
    key = jax.random.PRNGKey(0)
    kx, kp = jax.random.split(key)
    x = jax.random.normal(kx, (BATCH, SEQ, INPUT_SIZE), jnp.float32)
    params = init_params(kp)
    packed = pack_params(params)

    out = lstm_arbitrage_forward(x, packed)
    out = jax.block_until_ready(out)

    ref = reference_forward(x, params)
    assert out.shape == (BATCH, OUTPUT_SIZE), out.shape
    assert jnp.allclose(out, ref, atol=1e-4, rtol=1e-4), (out, ref)
    print("KERNEL_OK")
</pallas_src>

<mosaic_0001>
module attributes {stable_mosaic.version = 11 : i64} {
  func.func @_lstm_mlp_kernel(%arg0: memref<16x16xf32, #tpu.memory_space<vmem>>, %arg1: memref<248x128xf32, #tpu.memory_space<vmem>>, %arg2: memref<2x1xf32, #tpu.memory_space<vmem>>, %arg3: memref<16x128xf32, #tpu.memory_space<vmem>>) attributes {dimension_semantics = [], scalar_prefetch = 0 : i64, scratch_operands = 1 : i64, tpu.core_type = #tpu.core_type<tc>} {
    %c0 = arith.constant 0 : index
    %c0_0 = arith.constant 0 : index
    %0 = vector.load %arg0[%c0, %c0_0] : memref<16x16xf32, #tpu.memory_space<vmem>>, vector<16x16xf32>
    %c0_1 = arith.constant 0 : index
    %c0_2 = arith.constant 0 : index
    %1 = vector.load %arg1[%c0_1, %c0_2] : memref<248x128xf32, #tpu.memory_space<vmem>>, vector<16x128xf32>
    %cst = arith.constant dense<0.000000e+00> : vector<16x128xf32>
    %2 = tpu.matmul %0, %1, %cst {dimension_numbers = #tpu.dot_dimension_numbers<[1], [0], [0], [1], [0, 0, 1, 1], [], []>} : vector<16x16xf32>, vector<16x128xf32>, vector<16x128xf32> -> vector<16x128xf32>
    %c176 = arith.constant 176 : index
    %c0_3 = arith.constant 0 : index
    %3 = vector.load %arg1[%c176, %c0_3] : memref<248x128xf32, #tpu.memory_space<vmem>>, vector<1x128xf32>
    %4 = vector.broadcast %3 : vector<1x128xf32> to vector<16x128xf32>
    %5 = arith.addf %2, %4 : vector<16x128xf32>
    %c0_4 = arith.constant 0 : index
    %c0_5 = arith.constant 0 : index
    %6 = vector.load %arg3[%c0_4, %c0_5] : memref<16x128xf32, #tpu.memory_space<vmem>>, vector<16x128xf32>
    tpu.vector_store %arg3[%c0_4, %c0_5], %5 {strides = array<i32>} : memref<16x128xf32, #tpu.memory_space<vmem>>, vector<16x128xf32>,
    %c16 = arith.constant 16 : index
    %c0_6 = arith.constant 0 : index
    %7 = vector.load %arg1[%c16, %c0_6] : memref<248x128xf32, #tpu.memory_space<vmem>>, vector<32x128xf32>
    %c48 = arith.constant 48 : index
    %c0_7 = arith.constant 0 : index
    %8 = vector.load %arg1[%c48, %c0_7] : memref<248x128xf32, #tpu.memory_space<vmem>>, vector<64x128xf32>
    %c112 = arith.constant 112 : index
    %c0_8 = arith.constant 0 : index
    %9 = vector.load %arg1[%c112, %c0_8] : memref<248x128xf32, #tpu.memory_space<vmem>>, vector<64x128xf32>
    %c184 = arith.constant 184 : index
    %c0_9 = arith.constant 0 : index
    %10 = vector.load %arg1[%c184, %c0_9] : memref<248x128xf32, #tpu.memory_space<vmem>>, vector<1x128xf32>
    %c192 = arith.constant 192 : index
    %c0_10 = arith.constant 0 : index
    %11 = vector.load %arg1[%c192, %c0_10] : memref<248x128xf32, #tpu.memory_space<vmem>>, vector<1x128xf32>
    %cst_11 = arith.constant 0.000000e+00 : f32
    %12 = vector.broadcast %cst_11 : f32 to vector<2x32xf32>
    %c0_12 = arith.constant 0 : index
    %c0_13 = arith.constant 0 : index
    %13 = vector.load %arg3[%c0_12, %c0_13] : memref<16x128xf32, #tpu.memory_space<vmem>>, vector<2x128xf32>
    %cst_14 = arith.constant dense<0.000000e+00> : vector<2x128xf32>
    %14 = tpu.matmul %12, %7, %cst_14 {dimension_numbers = #tpu.dot_dimension_numbers<[1], [0], [0], [1], [0, 0, 1, 1], [], []>} : vector<2x32xf32>, vector<32x128xf32>, vector<2x128xf32> -> vector<2x128xf32>
    %15 = arith.addf %13, %14 : vector<2x128xf32>
    %16 = arith.negf %15 : vector<2x128xf32>
    %17 = math.exp %16 : vector<2x128xf32>
    %cst_15 = arith.constant 1.000000e+00 : f32
    %18 = vector.broadcast %cst_15 : f32 to vector<2x128xf32>
    %19 = arith.addf %18, %17 : vector<2x128xf32>
    %20 = arith.divf %18, %19 : vector<2x128xf32>
    %21 = vector.extract_strided_slice %20 {offsets = [0, 0], sizes = [2, 32], strides = [1, 1]} : vector<2x128xf32> to vector<2x32xf32>
    %22 = vector.extract_strided_slice %20 {offsets = [0, 32], sizes = [2, 32], strides = [1, 1]} : vector<2x128xf32> to vector<2x32xf32>
    %23 = vector.extract_strided_slice %20 {offsets = [0, 64], sizes = [2, 32], strides = [1, 1]} : vector<2x128xf32> to vector<2x32xf32>
    %cst_16 = arith.constant 2.000000e+00 : f32
    %24 = vector.broadcast %cst_16 : f32 to vector<2x32xf32>
    %25 = arith.mulf %24, %23 : vector<2x32xf32>
    %cst_17 = arith.constant 1.000000e+00 : f32
    %26 = vector.broadcast %cst_17 : f32 to vector<2x32xf32>
    %27 = arith.subf %25, %26 : vector<2x32xf32>
    %28 = vector.extract_strided_slice %20 {offsets = [0, 96], sizes = [2, 32], strides = [1, 1]} : vector<2x128xf32> to vector<2x32xf32>
    %29 = arith.mulf %22, %12 : vector<2x32xf32>
    %30 = arith.mulf %21, %27 : vector<2x32xf32>
    %31 = arith.addf %29, %30 : vector<2x32xf32>
    %32 = math.tanh %31 : vector<2x32xf32>
    %33 = arith.mulf %28, %32 : vector<2x32xf32>
    %34 = tpu.concatenate %33, %12 in 1 : vector<2x32xf32>, vector<2x32xf32> -> vector<2x64xf32>
    %cst_18 = arith.constant dense<0.000000e+00> : vector<2x128xf32>
    %35 = tpu.matmul %34, %8, %cst_18 {dimension_numbers = #tpu.dot_dimension_numbers<[1], [0], [0], [1], [0, 0, 1, 1], [], []>} : vector<2x64xf32>, vector<64x128xf32>, vector<2x128xf32> -> vector<2x128xf32>
    %36 = vector.broadcast %10 : vector<1x128xf32> to vector<2x128xf32>
    %37 = arith.addf %35, %36 : vector<2x128xf32>
    %38 = arith.negf %37 : vector<2x128xf32>
    %39 = math.exp %38 : vector<2x128xf32>
    %cst_19 = arith.constant 1.000000e+00 : f32
    %40 = vector.broadcast %cst_19 : f32 to vector<2x128xf32>
    %41 = arith.addf %40, %39 : vector<2x128xf32>
    %42 = arith.divf %40, %41 : vector<2x128xf32>
    %43 = vector.extract_strided_slice %42 {offsets = [0, 0], sizes = [2, 32], strides = [1, 1]} : vector<2x128xf32> to vector<2x32xf32>
    %44 = vector.extract_strided_slice %42 {offsets = [0, 32], sizes = [2, 32], strides = [1, 1]} : vector<2x128xf32> to vector<2x32xf32>
    %45 = vector.extract_strided_slice %42 {offsets = [0, 64], sizes = [2, 32], strides = [1, 1]} : vector<2x128xf32> to vector<2x32xf32>
    %cst_20 = arith.constant 2.000000e+00 : f32
    %46 = vector.broadcast %cst_20 : f32 to vector<2x32xf32>
    %47 = arith.mulf %46, %45 : vector<2x32xf32>
    %cst_21 = arith.constant 1.000000e+00 : f32
    %48 = vector.broadcast %cst_21 : f32 to vector<2x32xf32>
    %49 = arith.subf %47, %48 : vector<2x32xf32>
    %50 = vector.extract_strided_slice %42 {offsets = [0, 96], sizes = [2, 32], strides = [1, 1]} : vector<2x128xf32> to vector<2x32xf32>
    %51 = arith.mulf %44, %12 : vector<2x32xf32>
    %52 = arith.mulf %43, %49 : vector<2x32xf32>
    %53 = arith.addf %51, %52 : vector<2x32xf32>
    %54 = math.tanh %53 : vector<2x32xf32>
    %55 = arith.mulf %50, %54 : vector<2x32xf32>
    %c2 = arith.constant 2 : index
    %c0_22 = arith.constant 0 : index
    %56 = vector.load %arg3[%c2, %c0_22] : memref<16x128xf32, #tpu.memory_space<vmem>>, vector<2x128xf32>
    %cst_23 = arith.constant dense<0.000000e+00> : vector<2x128xf32>
    %57 = tpu.matmul %33, %7, %cst_23 {dimension_numbers = #tpu.dot_dimension_numbers<[1], [0], [0], [1], [0, 0, 1, 1], [], []>} : vector<2x32xf32>, vector<32x128xf32>, vector<2x128xf32> -> vector<2x128xf32>
    %58 = arith.addf %56, %57 : vector<2x128xf32>
    %59 = arith.negf %58 : vector<2x128xf32>
    %60 = math.exp %59 : vector<2x128xf32>
    %cst_24 = arith.constant 1.000000e+00 : f32
    %61 = vector.broadcast %cst_24 : f32 to vector<2x128xf32>
    %62 = arith.addf %61, %60 : vector<2x128xf32>
    %63 = arith.divf %61, %62 : vector<2x128xf32>
    %64 = vector.extract_strided_slice %63 {offsets = [0, 0], sizes = [2, 32], strides = [1, 1]} : vector<2x128xf32> to vector<2x32xf32>
    %65 = vector.extract_strided_slice %63 {offsets = [0, 32], sizes = [2, 32], strides = [1, 1]} : vector<2x128xf32> to vector<2x32xf32>
    %66 = vector.extract_strided_slice %63 {offsets = [0, 64], sizes = [2, 32], strides = [1, 1]} : vector<2x128xf32> to vector<2x32xf32>
    %cst_25 = arith.constant 2.000000e+00 : f32
    %67 = vector.broadcast %cst_25 : f32 to vector<2x32xf32>
    %68 = arith.mulf %67, %66 : vector<2x32xf32>
    %cst_26 = arith.constant 1.000000e+00 : f32
    %69 = vector.broadcast %cst_26 : f32 to vector<2x32xf32>
    %70 = arith.subf %68, %69 : vector<2x32xf32>
    %71 = vector.extract_strided_slice %63 {offsets = [0, 96], sizes = [2, 32], strides = [1, 1]} : vector<2x128xf32> to vector<2x32xf32>
    %72 = arith.mulf %65, %31 : vector<2x32xf32>
    %73 = arith.mulf %64, %70 : vector<2x32xf32>
    %74 = arith.addf %72, %73 : vector<2x32xf32>
    %75 = math.tanh %74 : vector<2x32xf32>
    %76 = arith.mulf %71, %75 : vector<2x32xf32>
    %77 = tpu.concatenate %55, %12 in 1 : vector<2x32xf32>, vector<2x32xf32> -> vector<2x64xf32>
    %cst_27 = arith.constant dense<0.000000e+00> : vector<2x128xf32>
    %78 = tpu.matmul %77, %9, %cst_27 {dimension_numbers = #tpu.dot_dimension_numbers<[1], [0], [0], [1], [0, 0, 1, 1], [], []>} : vector<2x64xf32>, vector<64x128xf32>, vector<2x128xf32> -> vector<2x128xf32>
    %79 = vector.broadcast %11 : vector<1x128xf32> to vector<2x128xf32>
    %80 = arith.addf %78, %79 : vector<2x128xf32>
    %81 = arith.negf %80 : vector<2x128xf32>
    %82 = math.exp %81 : vector<2x128xf32>
    %cst_28 = arith.constant 1.000000e+00 : f32
    %83 = vector.broadcast %cst_28 : f32 to vector<2x128xf32>
    %84 = arith.addf %83, %82 : vector<2x128xf32>
    %85 = arith.divf %83, %84 : vector<2x128xf32>
    %86 = vector.extract_strided_slice %85 {offsets = [0, 0], sizes = [2, 32], strides = [1, 1]} : vector<2x128xf32> to vector<2x32xf32>
    %87 = vector.extract_strided_slice %85 {offsets = [0, 32], sizes = [2, 32], strides = [1, 1]} : vector<2x128xf32> to vector<2x32xf32>
    %88 = vector.extract_strided_slice %85 {offsets = [0, 64], sizes = [2, 32], strides = [1, 1]} : vector<2x128xf32> to vector<2x32xf32>
    %cst_29 = arith.constant 2.000000e+00 : f32
    %89 = vector.broadcast %cst_29 : f32 to vector<2x32xf32>
    %90 = arith.mulf %89, %88 : vector<2x32xf32>
    %cst_30 = arith.constant 1.000000e+00 : f32
    %91 = vector.broadcast %cst_30 : f32 to vector<2x32xf32>
    %92 = arith.subf %90, %91 : vector<2x32xf32>
    %93 = vector.extract_strided_slice %85 {offsets = [0, 96], sizes = [2, 32], strides = [1, 1]} : vector<2x128xf32> to vector<2x32xf32>
    %94 = arith.mulf %87, %12 : vector<2x32xf32>
    %95 = arith.mulf %86, %92 : vector<2x32xf32>
    %96 = arith.addf %94, %95 : vector<2x32xf32>
    %97 = math.tanh %96 : vector<2x32xf32>
    %98 = arith.mulf %93, %97 : vector<2x32xf32>
    %99 = tpu.concatenate %76, %55 in 1 : vector<2x32xf32>, vector<2x32xf32> -> vector<2x64xf32>
    %cst_31 = arith.constant dense<0.000000e+00> : vector<2x128xf32>
    %100 = tpu.matmul %99, %8, %cst_31 {dimension_numbers = #tpu.dot_dimension_numbers<[1], [0], [0], [1], [0, 0, 1, 1], [], []>} : vector<2x64xf32>, vector<64x128xf32>, vector<2x128xf32> -> vector<2x128xf32>
    %101 = vector.broadcast %10 : vector<1x128xf32> to vector<2x128xf32>
    %102 = arith.addf %100, %101 : vector<2x128xf32>
    %103 = arith.negf %102 : vector<2x128xf32>
    %104 = math.exp %103 : vector<2x128xf32>
    %cst_32 = arith.constant 1.000000e+00 : f32
    %105 = vector.broadcast %cst_32 : f32 to vector<2x128xf32>
    %106 = arith.addf %105, %104 : vector<2x128xf32>
    %107 = arith.divf %105, %106 : vector<2x128xf32>
    %108 = vector.extract_strided_slice %107 {offsets = [0, 0], sizes = [2, 32], strides = [1, 1]} : vector<2x128xf32> to vector<2x32xf32>
    %109 = vector.extract_strided_slice %107 {offsets = [0, 32], sizes = [2, 32], strides = [1, 1]} : vector<2x128xf32> to vector<2x32xf32>
    %110 = vector.extract_strided_slice %107 {offsets = [0, 64], sizes = [2, 32], strides = [1, 1]} : vector<2x128xf32> to vector<2x32xf32>
    %cst_33 = arith.constant 2.000000e+00 : f32
    %111 = vector.broadcast %cst_33 : f32 to vector<2x32xf32>
    %112 = arith.mulf %111, %110 : vector<2x32xf32>
    %cst_34 = arith.constant 1.000000e+00 : f32
    %113 = vector.broadcast %cst_34 : f32 to vector<2x32xf32>
    %114 = arith.subf %112, %113 : vector<2x32xf32>
    %115 = vector.extract_strided_slice %107 {offsets = [0, 96], sizes = [2, 32], strides = [1, 1]} : vector<2x128xf32> to vector<2x32xf32>
    %116 = arith.mulf %109, %53 : vector<2x32xf32>
    %117 = arith.mulf %108, %114 : vector<2x32xf32>
    %118 = arith.addf %116, %117 : vector<2x32xf32>
    %119 = math.tanh %118 : vector<2x32xf32>
    %120 = arith.mulf %115, %119 : vector<2x32xf32>
    %c4 = arith.constant 4 : index
    %c0_35 = arith.constant 0 : index
    %121 = vector.load %arg3[%c4, %c0_35] : memref<16x128xf32, #tpu.memory_space<vmem>>, vector<2x128xf32>
    %cst_36 = arith.constant dense<0.000000e+00> : vector<2x128xf32>
    %122 = tpu.matmul %76, %7, %cst_36 {dimension_numbers = #tpu.dot_dimension_numbers<[1], [0], [0], [1], [0, 0, 1, 1], [], []>} : vector<2x32xf32>, vector<32x128xf32>, vector<2x128xf32> -> vector<2x128xf32>
    %123 = arith.addf %121, %122 : vector<2x128xf32>
    %124 = arith.negf %123 : vector<2x128xf32>
    %125 = math.exp %124 : vector<2x128xf32>
    %cst_37 = arith.constant 1.000000e+00 : f32
    %126 = vector.broadcast %cst_37 : f32 to vector<2x128xf32>
    %127 = arith.addf %126, %125 : vector<2x128xf32>
    %128 = arith.divf %126, %127 : vector<2x128xf32>
    %129 = vector.extract_strided_slice %128 {offsets = [0, 0], sizes = [2, 32], strides = [1, 1]} : vector<2x128xf32> to vector<2x32xf32>
    %130 = vector.extract_strided_slice %128 {offsets = [0, 32], sizes = [2, 32], strides = [1, 1]} : vector<2x128xf32> to vector<2x32xf32>
    %131 = vector.extract_strided_slice %128 {offsets = [0, 64], sizes = [2, 32], strides = [1, 1]} : vector<2x128xf32> to vector<2x32xf32>
    %cst_38 = arith.constant 2.000000e+00 : f32
    %132 = vector.broadcast %cst_38 : f32 to vector<2x32xf32>
    %133 = arith.mulf %132, %131 : vector<2x32xf32>
    %cst_39 = arith.constant 1.000000e+00 : f32
    %134 = vector.broadcast %cst_39 : f32 to vector<2x32xf32>
    %135 = arith.subf %133, %134 : vector<2x32xf32>
    %136 = vector.extract_strided_slice %128 {offsets = [0, 96], sizes = [2, 32], strides = [1, 1]} : vector<2x128xf32> to vector<2x32xf32>
    %137 = arith.mulf %130, %74 : vector<2x32xf32>
    %138 = arith.mulf %129, %135 : vector<2x32xf32>
    %139 = arith.addf %137, %138 : vector<2x32xf32>
    %140 = math.tanh %139 : vector<2x32xf32>
    %141 = arith.mulf %136, %140 : vector<2x32xf32>
    %142 = tpu.concatenate %120, %98 in 1 : vector<2x32xf32>, vector<2x32xf32> -> vector<2x64xf32>
    %cst_40 = arith.constant dense<0.000000e+00> : vector<2x128xf32>
    %143 = tpu.matmul %142, %9, %cst_40 {dimension_numbers = #tpu.dot_dimension_numbers<[1], [0], [0], [1], [0, 0, 1, 1], [], []>} : vector<2x64xf32>, vector<64x128xf32>, vector<2x128xf32> -> vector<2x128xf32>
    %144 = vector.broadcast %11 : vector<1x128xf32> to vector<2x128xf32>
    %145 = arith.addf %143, %144 : vector<2x128xf32>
    %146 = arith.negf %145 : vector<2x128xf32>
    %147 = math.exp %146 : vector<2x128xf32>
    %cst_41 = arith.constant 1.000000e+00 : f32
    %148 = vector.broadcast %cst_41 : f32 to vector<2x128xf32>
    %149 = arith.addf %148, %147 : vector<2x128xf32>
    %150 = arith.divf %148, %149 : vector<2x128xf32>
    %151 = vector.extract_strided_slice %150 {offsets = [0, 0], sizes = [2, 32], strides = [1, 1]} : vector<2x128xf32> to vector<2x32xf32>
    %152 = vector.extract_strided_slice %150 {offsets = [0, 32], sizes = [2, 32], strides = [1, 1]} : vector<2x128xf32> to vector<2x32xf32>
    %153 = vector.extract_strided_slice %150 {offsets = [0, 64], sizes = [2, 32], strides = [1, 1]} : vector<2x128xf32> to vector<2x32xf32>
    %cst_42 = arith.constant 2.000000e+00 : f32
    %154 = vector.broadcast %cst_42 : f32 to vector<2x32xf32>
    %155 = arith.mulf %154, %153 : vector<2x32xf32>
    %cst_43 = arith.constant 1.000000e+00 : f32
    %156 = vector.broadcast %cst_43 : f32 to vector<2x32xf32>
    %157 = arith.subf %155, %156 : vector<2x32xf32>
    %158 = vector.extract_strided_slice %150 {offsets = [0, 96], sizes = [2, 32], strides = [1, 1]} : vector<2x128xf32> to vector<2x32xf32>
    %159 = arith.mulf %152, %96 : vector<2x32xf32>
    %160 = arith.mulf %151, %157 : vector<2x32xf32>
    %161 = arith.addf %159, %160 : vector<2x32xf32>
    %162 = math.tanh %161 : vector<2x32xf32>
    %163 = arith.mulf %158, %162 : vector<2x32xf32>
    %164 = tpu.concatenate %141, %120 in 1 : vector<2x32xf32>, vector<2x32xf32> -> vector<2x64xf32>
    %cst_44 = arith.constant dense<0.000000e+00> : vector<2x128xf32>
    %165 = tpu.matmul %164, %8, %cst_44 {dimension_numbers = #tpu.dot_dimension_numbers<[1], [0], [0], [1], [0, 0, 1, 1], [], []>} : vector<2x64xf32>, vector<64x128xf32>, vector<2x128xf32> -> vector<2x128xf32>
    %166 = vector.broadcast %10 : vector<1x128xf32> to vector<2x128xf32>
    %167 = arith.addf %165, %166 : vector<2x128xf32>
    %168 = arith.negf %167 : vector<2x128xf32>
    %169 = math.exp %168 : vector<2x128xf32>
    %cst_45 = arith.constant 1.000000e+00 : f32
    %170 = vector.broadcast %cst_45 : f32 to vector<2x128xf32>
    %171 = arith.addf %170, %169 : vector<2x128xf32>
    %172 = arith.divf %170, %171 : vector<2x128xf32>
    %173 = vector.extract_strided_slice %172 {offsets = [0, 0], sizes = [2, 32], strides = [1, 1]} : vector<2x128xf32> to vector<2x32xf32>
    %174 = vector.extract_strided_slice %172 {offsets = [0, 32], sizes = [2, 32], strides = [1, 1]} : vector<2x128xf32> to vector<2x32xf32>
    %175 = vector.extract_strided_slice %172 {offsets = [0, 64], sizes = [2, 32], strides = [1, 1]} : vector<2x128xf32> to vector<2x32xf32>
    %cst_46 = arith.constant 2.000000e+00 : f32
    %176 = vector.broadcast %cst_46 : f32 to vector<2x32xf32>
    %177 = arith.mulf %176, %175 : vector<2x32xf32>
    %cst_47 = arith.constant 1.000000e+00 : f32
    %178 = vector.broadcast %cst_47 : f32 to vector<2x32xf32>
    %179 = arith.subf %177, %178 : vector<2x32xf32>
    %180 = vector.extract_strided_slice %172 {offsets = [0, 96], sizes = [2, 32], strides = [1, 1]} : vector<2x128xf32> to vector<2x32xf32>
    %181 = arith.mulf %174, %118 : vector<2x32xf32>
    %182 = arith.mulf %173, %179 : vector<2x32xf32>
    %183 = arith.addf %181, %182 : vector<2x32xf32>
    %184 = math.tanh %183 : vector<2x32xf32>
    %185 = arith.mulf %180, %184 : vector<2x32xf32>
    %c6 = arith.constant 6 : index
    %c0_48 = arith.constant 0 : index
    %186 = vector.load %arg3[%c6, %c0_48] : memref<16x128xf32, #tpu.memory_space<vmem>>, vector<2x128xf32>
    %cst_49 = arith.constant dense<0.000000e+00> : vector<2x128xf32>
    %187 = tpu.matmul %141, %7, %cst_49 {dimension_numbers = #tpu.dot_dimension_numbers<[1], [0], [0], [1], [0, 0, 1, 1], [], []>} : vector<2x32xf32>, vector<32x128xf32>, vector<2x128xf32> -> vector<2x128xf32>
    %188 = arith.addf %186, %187 : vector<2x128xf32>
    %189 = arith.negf %188 : vector<2x128xf32>
    %190 = math.exp %189 : vector<2x128xf32>
    %cst_50 = arith.constant 1.000000e+00 : f32
    %191 = vector.broadcast %cst_50 : f32 to vector<2x128xf32>
    %192 = arith.addf %191, %190 : vector<2x128xf32>
    %193 = arith.divf %191, %192 : vector<2x128xf32>
    %194 = vector.extract_strided_slice %193 {offsets = [0, 0], sizes = [2, 32], strides = [1, 1]} : vector<2x128xf32> to vector<2x32xf32>
    %195 = vector.extract_strided_slice %193 {offsets = [0, 32], sizes = [2, 32], strides = [1, 1]} : vector<2x128xf32> to vector<2x32xf32>
    %196 = vector.extract_strided_slice %193 {offsets = [0, 64], sizes = [2, 32], strides = [1, 1]} : vector<2x128xf32> to vector<2x32xf32>
    %cst_51 = arith.constant 2.000000e+00 : f32
    %197 = vector.broadcast %cst_51 : f32 to vector<2x32xf32>
    %198 = arith.mulf %197, %196 : vector<2x32xf32>
    %cst_52 = arith.constant 1.000000e+00 : f32
    %199 = vector.broadcast %cst_52 : f32 to vector<2x32xf32>
    %200 = arith.subf %198, %199 : vector<2x32xf32>
    %201 = vector.extract_strided_slice %193 {offsets = [0, 96], sizes = [2, 32], strides = [1, 1]} : vector<2x128xf32> to vector<2x32xf32>
    %202 = arith.mulf %195, %139 : vector<2x32xf32>
    %203 = arith.mulf %194, %200 : vector<2x32xf32>
    %204 = arith.addf %202, %203 : vector<2x32xf32>
    %205 = math.tanh %204 : vector<2x32xf32>
    %206 = arith.mulf %201, %205 : vector<2x32xf32>
    %207 = tpu.concatenate %185, %163 in 1 : vector<2x32xf32>, vector<2x32xf32> -> vector<2x64xf32>
    %cst_53 = arith.constant dense<0.000000e+00> : vector<2x128xf32>
    %208 = tpu.matmul %207, %9, %cst_53 {dimension_numbers = #tpu.dot_dimension_numbers<[1], [0], [0], [1], [0, 0, 1, 1], [], []>} : vector<2x64xf32>, vector<64x128xf32>, vector<2x128xf32> -> vector<2x128xf32>
    %209 = vector.broadcast %11 : vector<1x128xf32> to vector<2x128xf32>
    %210 = arith.addf %208, %209 : vector<2x128xf32>
    %211 = arith.negf %210 : vector<2x128xf32>
    %212 = math.exp %211 : vector<2x128xf32>
    %cst_54 = arith.constant 1.000000e+00 : f32
    %213 = vector.broadcast %cst_54 : f32 to vector<2x128xf32>
    %214 = arith.addf %213, %212 : vector<2x128xf32>
    %215 = arith.divf %213, %214 : vector<2x128xf32>
    %216 = vector.extract_strided_slice %215 {offsets = [0, 0], sizes = [2, 32], strides = [1, 1]} : vector<2x128xf32> to vector<2x32xf32>
    %217 = vector.extract_strided_slice %215 {offsets = [0, 32], sizes = [2, 32], strides = [1, 1]} : vector<2x128xf32> to vector<2x32xf32>
    %218 = vector.extract_strided_slice %215 {offsets = [0, 64], sizes = [2, 32], strides = [1, 1]} : vector<2x128xf32> to vector<2x32xf32>
    %cst_55 = arith.constant 2.000000e+00 : f32
    %219 = vector.broadcast %cst_55 : f32 to vector<2x32xf32>
    %220 = arith.mulf %219, %218 : vector<2x32xf32>
    %cst_56 = arith.constant 1.000000e+00 : f32
    %221 = vector.broadcast %cst_56 : f32 to vector<2x32xf32>
    %222 = arith.subf %220, %221 : vector<2x32xf32>
    %223 = vector.extract_strided_slice %215 {offsets = [0, 96], sizes = [2, 32], strides = [1, 1]} : vector<2x128xf32> to vector<2x32xf32>
    %224 = arith.mulf %217, %161 : vector<2x32xf32>
    %225 = arith.mulf %216, %222 : vector<2x32xf32>
    %226 = arith.addf %224, %225 : vector<2x32xf32>
    %227 = math.tanh %226 : vector<2x32xf32>
    %228 = arith.mulf %223, %227 : vector<2x32xf32>
    %229 = tpu.concatenate %206, %185 in 1 : vector<2x32xf32>, vector<2x32xf32> -> vector<2x64xf32>
    %cst_57 = arith.constant dense<0.000000e+00> : vector<2x128xf32>
    %230 = tpu.matmul %229, %8, %cst_57 {dimension_numbers = #tpu.dot_dimension_numbers<[1], [0], [0], [1], [0, 0, 1, 1], [], []>} : vector<2x64xf32>, vector<64x128xf32>, vector<2x128xf32> -> vector<2x128xf32>
    %231 = vector.broadcast %10 : vector<1x128xf32> to vector<2x128xf32>
    %232 = arith.addf %230, %231 : vector<2x128xf32>
    %233 = arith.negf %232 : vector<2x128xf32>
    %234 = math.exp %233 : vector<2x128xf32>
    %cst_58 = arith.constant 1.000000e+00 : f32
    %235 = vector.broadcast %cst_58 : f32 to vector<2x128xf32>
    %236 = arith.addf %235, %234 : vector<2x128xf32>
    %237 = arith.divf %235, %236 : vector<2x128xf32>
    %238 = vector.extract_strided_slice %237 {offsets = [0, 0], sizes = [2, 32], strides = [1, 1]} : vector<2x128xf32> to vector<2x32xf32>
    %239 = vector.extract_strided_slice %237 {offsets = [0, 32], sizes = [2, 32], strides = [1, 1]} : vector<2x128xf32> to vector<2x32xf32>
    %240 = vector.extract_strided_slice %237 {offsets = [0, 64], sizes = [2, 32], strides = [1, 1]} : vector<2x128xf32> to vector<2x32xf32>
    %cst_59 = arith.constant 2.000000e+00 : f32
    %241 = vector.broadcast %cst_59 : f32 to vector<2x32xf32>
    %242 = arith.mulf %241, %240 : vector<2x32xf32>
    %cst_60 = arith.constant 1.000000e+00 : f32
    %243 = vector.broadcast %cst_60 : f32 to vector<2x32xf32>
    %244 = arith.subf %242, %243 : vector<2x32xf32>
    %245 = vector.extract_strided_slice %237 {offsets = [0, 96], sizes = [2, 32], strides = [1, 1]} : vector<2x128xf32> to vector<2x32xf32>
    %246 = arith.mulf %239, %183 : vector<2x32xf32>
    %247 = arith.mulf %238, %244 : vector<2x32xf32>
    %248 = arith.addf %246, %247 : vector<2x32xf32>
    %249 = math.tanh %248 : vector<2x32xf32>
    %250 = arith.mulf %245, %249 : vector<2x32xf32>
    %c8 = arith.constant 8 : index
    %c0_61 = arith.constant 0 : index
    %251 = vector.load %arg3[%c8, %c0_61] : memref<16x128xf32, #tpu.memory_space<vmem>>, vector<2x128xf32>
    %cst_62 = arith.constant dense<0.000000e+00> : vector<2x128xf32>
    %252 = tpu.matmul %206, %7, %cst_62 {dimension_numbers = #tpu.dot_dimension_numbers<[1], [0], [0], [1], [0, 0, 1, 1], [], []>} : vector<2x32xf32>, vector<32x128xf32>, vector<2x128xf32> -> vector<2x128xf32>
    %253 = arith.addf %251, %252 : vector<2x128xf32>
    %254 = arith.negf %253 : vector<2x128xf32>
    %255 = math.exp %254 : vector<2x128xf32>
    %cst_63 = arith.constant 1.000000e+00 : f32
    %256 = vector.broadcast %cst_63 : f32 to vector<2x128xf32>
    %257 = arith.addf %256, %255 : vector<2x128xf32>
    %258 = arith.divf %256, %257 : vector<2x128xf32>
    %259 = vector.extract_strided_slice %258 {offsets = [0, 0], sizes = [2, 32], strides = [1, 1]} : vector<2x128xf32> to vector<2x32xf32>
    %260 = vector.extract_strided_slice %258 {offsets = [0, 32], sizes = [2, 32], strides = [1, 1]} : vector<2x128xf32> to vector<2x32xf32>
    %261 = vector.extract_strided_slice %258 {offsets = [0, 64], sizes = [2, 32], strides = [1, 1]} : vector<2x128xf32> to vector<2x32xf32>
    %cst_64 = arith.constant 2.000000e+00 : f32
    %262 = vector.broadcast %cst_64 : f32 to vector<2x32xf32>
    %263 = arith.mulf %262, %261 : vector<2x32xf32>
    %cst_65 = arith.constant 1.000000e+00 : f32
    %264 = vector.broadcast %cst_65 : f32 to vector<2x32xf32>
    %265 = arith.subf %263, %264 : vector<2x32xf32>
    %266 = vector.extract_strided_slice %258 {offsets = [0, 96], sizes = [2, 32], strides = [1, 1]} : vector<2x128xf32> to vector<2x32xf32>
    %267 = arith.mulf %260, %204 : vector<2x32xf32>
    %268 = arith.mulf %259, %265 : vector<2x32xf32>
    %269 = arith.addf %267, %268 : vector<2x32xf32>
    %270 = math.tanh %269 : vector<2x32xf32>
    %271 = arith.mulf %266, %270 : vector<2x32xf32>
    %272 = tpu.concatenate %250, %228 in 1 : vector<2x32xf32>, vector<2x32xf32> -> vector<2x64xf32>
    %cst_66 = arith.constant dense<0.000000e+00> : vector<2x128xf32>
    %273 = tpu.matmul %272, %9, %cst_66 {dimension_numbers = #tpu.dot_dimension_numbers<[1], [0], [0], [1], [0, 0, 1, 1], [], []>} : vector<2x64xf32>, vector<64x128xf32>, vector<2x128xf32> -> vector<2x128xf32>
    %274 = vector.broadcast %11 : vector<1x128xf32> to vector<2x128xf32>
    %275 = arith.addf %273, %274 : vector<2x128xf32>
    %276 = arith.negf %275 : vector<2x128xf32>
    %277 = math.exp %276 : vector<2x128xf32>
    %cst_67 = arith.constant 1.000000e+00 : f32
    %278 = vector.broadcast %cst_67 : f32 to vector<2x128xf32>
    %279 = arith.addf %278, %277 : vector<2x128xf32>
    %280 = arith.divf %278, %279 : vector<2x128xf32>
    %281 = vector.extract_strided_slice %280 {offsets = [0, 0], sizes = [2, 32], strides = [1, 1]} : vector<2x128xf32> to vector<2x32xf32>
    %282 = vector.extract_strided_slice %280 {offsets = [0, 32], sizes = [2, 32], strides = [1, 1]} : vector<2x128xf32> to vector<2x32xf32>
    %283 = vector.extract_strided_slice %280 {offsets = [0, 64], sizes = [2, 32], strides = [1, 1]} : vector<2x128xf32> to vector<2x32xf32>
    %cst_68 = arith.constant 2.000000e+00 : f32
    %284 = vector.broadcast %cst_68 : f32 to vector<2x32xf32>
    %285 = arith.mulf %284, %283 : vector<2x32xf32>
    %cst_69 = arith.constant 1.000000e+00 : f32
    %286 = vector.broadcast %cst_69 : f32 to vector<2x32xf32>
    %287 = arith.subf %285, %286 : vector<2x32xf32>
    %288 = vector.extract_strided_slice %280 {offsets = [0, 96], sizes = [2, 32], strides = [1, 1]} : vector<2x128xf32> to vector<2x32xf32>
    %289 = arith.mulf %282, %226 : vector<2x32xf32>
    %290 = arith.mulf %281, %287 : vector<2x32xf32>
    %291 = arith.addf %289, %290 : vector<2x32xf32>
    %292 = math.tanh %291 : vector<2x32xf32>
    %293 = arith.mulf %288, %292 : vector<2x32xf32>
    %294 = tpu.concatenate %271, %250 in 1 : vector<2x32xf32>, vector<2x32xf32> -> vector<2x64xf32>
    %cst_70 = arith.constant dense<0.000000e+00> : vector<2x128xf32>
    %295 = tpu.matmul %294, %8, %cst_70 {dimension_numbers = #tpu.dot_dimension_numbers<[1], [0], [0], [1], [0, 0, 1, 1], [], []>} : vector<2x64xf32>, vector<64x128xf32>, vector<2x128xf32> -> vector<2x128xf32>
    %296 = vector.broadcast %10 : vector<1x128xf32> to vector<2x128xf32>
    %297 = arith.addf %295, %296 : vector<2x128xf32>
    %298 = arith.negf %297 : vector<2x128xf32>
    %299 = math.exp %298 : vector<2x128xf32>
    %cst_71 = arith.constant 1.000000e+00 : f32
    %300 = vector.broadcast %cst_71 : f32 to vector<2x128xf32>
    %301 = arith.addf %300, %299 : vector<2x128xf32>
    %302 = arith.divf %300, %301 : vector<2x128xf32>
    %303 = vector.extract_strided_slice %302 {offsets = [0, 0], sizes = [2, 32], strides = [1, 1]} : vector<2x128xf32> to vector<2x32xf32>
    %304 = vector.extract_strided_slice %302 {offsets = [0, 32], sizes = [2, 32], strides = [1, 1]} : vector<2x128xf32> to vector<2x32xf32>
    %305 = vector.extract_strided_slice %302 {offsets = [0, 64], sizes = [2, 32], strides = [1, 1]} : vector<2x128xf32> to vector<2x32xf32>
    %cst_72 = arith.constant 2.000000e+00 : f32
    %306 = vector.broadcast %cst_72 : f32 to vector<2x32xf32>
    %307 = arith.mulf %306, %305 : vector<2x32xf32>
    %cst_73 = arith.constant 1.000000e+00 : f32
    %308 = vector.broadcast %cst_73 : f32 to vector<2x32xf32>
    %309 = arith.subf %307, %308 : vector<2x32xf32>
    %310 = vector.extract_strided_slice %302 {offsets = [0, 96], sizes = [2, 32], strides = [1, 1]} : vector<2x128xf32> to vector<2x32xf32>
    %311 = arith.mulf %304, %248 : vector<2x32xf32>
    %312 = arith.mulf %303, %309 : vector<2x32xf32>
    %313 = arith.addf %311, %312 : vector<2x32xf32>
    %314 = math.tanh %313 : vector<2x32xf32>
    %315 = arith.mulf %310, %314 : vector<2x32xf32>
    %c10 = arith.constant 10 : index
    %c0_74 = arith.constant 0 : index
    %316 = vector.load %arg3[%c10, %c0_74] : memref<16x128xf32, #tpu.memory_space<vmem>>, vector<2x128xf32>
    %cst_75 = arith.constant dense<0.000000e+00> : vector<2x128xf32>
    %317 = tpu.matmul %271, %7, %cst_75 {dimension_numbers = #tpu.dot_dimension_numbers<[1], [0], [0], [1], [0, 0, 1, 1], [], []>} : vector<2x32xf32>, vector<32x128xf32>, vector<2x128xf32> -> vector<2x128xf32>
    %318 = arith.addf %316, %317 : vector<2x128xf32>
    %319 = arith.negf %318 : vector<2x128xf32>
    %320 = math.exp %319 : vector<2x128xf32>
    %cst_76 = arith.constant 1.000000e+00 : f32
    %321 = vector.broadcast %cst_76 : f32 to vector<2x128xf32>
    %322 = arith.addf %321, %320 : vector<2x128xf32>
    %323 = arith.divf %321, %322 : vector<2x128xf32>
    %324 = vector.extract_strided_slice %323 {offsets = [0, 0], sizes = [2, 32], strides = [1, 1]} : vector<2x128xf32> to vector<2x32xf32>
    %325 = vector.extract_strided_slice %323 {offsets = [0, 32], sizes = [2, 32], strides = [1, 1]} : vector<2x128xf32> to vector<2x32xf32>
    %326 = vector.extract_strided_slice %323 {offsets = [0, 64], sizes = [2, 32], strides = [1, 1]} : vector<2x128xf32> to vector<2x32xf32>
    %cst_77 = arith.constant 2.000000e+00 : f32
    %327 = vector.broadcast %cst_77 : f32 to vector<2x32xf32>
    %328 = arith.mulf %327, %326 : vector<2x32xf32>
    %cst_78 = arith.constant 1.000000e+00 : f32
    %329 = vector.broadcast %cst_78 : f32 to vector<2x32xf32>
    %330 = arith.subf %328, %329 : vector<2x32xf32>
    %331 = vector.extract_strided_slice %323 {offsets = [0, 96], sizes = [2, 32], strides = [1, 1]} : vector<2x128xf32> to vector<2x32xf32>
    %332 = arith.mulf %325, %269 : vector<2x32xf32>
    %333 = arith.mulf %324, %330 : vector<2x32xf32>
    %334 = arith.addf %332, %333 : vector<2x32xf32>
    %335 = math.tanh %334 : vector<2x32xf32>
    %336 = arith.mulf %331, %335 : vector<2x32xf32>
    %337 = tpu.concatenate %315, %293 in 1 : vector<2x32xf32>, vector<2x32xf32> -> vector<2x64xf32>
    %cst_79 = arith.constant dense<0.000000e+00> : vector<2x128xf32>
    %338 = tpu.matmul %337, %9, %cst_79 {dimension_numbers = #tpu.dot_dimension_numbers<[1], [0], [0], [1], [0, 0, 1, 1], [], []>} : vector<2x64xf32>, vector<64x128xf32>, vector<2x128xf32> -> vector<2x128xf32>
    %339 = vector.broadcast %11 : vector<1x128xf32> to vector<2x128xf32>
    %340 = arith.addf %338, %339 : vector<2x128xf32>
    %341 = arith.negf %340 : vector<2x128xf32>
    %342 = math.exp %341 : vector<2x128xf32>
    %cst_80 = arith.constant 1.000000e+00 : f32
    %343 = vector.broadcast %cst_80 : f32 to vector<2x128xf32>
    %344 = arith.addf %343, %342 : vector<2x128xf32>
    %345 = arith.divf %343, %344 : vector<2x128xf32>
    %346 = vector.extract_strided_slice %345 {offsets = [0, 0], sizes = [2, 32], strides = [1, 1]} : vector<2x128xf32> to vector<2x32xf32>
    %347 = vector.extract_strided_slice %345 {offsets = [0, 32], sizes = [2, 32], strides = [1, 1]} : vector<2x128xf32> to vector<2x32xf32>
    %348 = vector.extract_strided_slice %345 {offsets = [0, 64], sizes = [2, 32], strides = [1, 1]} : vector<2x128xf32> to vector<2x32xf32>
    %cst_81 = arith.constant 2.000000e+00 : f32
    %349 = vector.broadcast %cst_81 : f32 to vector<2x32xf32>
    %350 = arith.mulf %349, %348 : vector<2x32xf32>
    %cst_82 = arith.constant 1.000000e+00 : f32
    %351 = vector.broadcast %cst_82 : f32 to vector<2x32xf32>
    %352 = arith.subf %350, %351 : vector<2x32xf32>
    %353 = vector.extract_strided_slice %345 {offsets = [0, 96], sizes = [2, 32], strides = [1, 1]} : vector<2x128xf32> to vector<2x32xf32>
    %354 = arith.mulf %347, %291 : vector<2x32xf32>
    %355 = arith.mulf %346, %352 : vector<2x32xf32>
    %356 = arith.addf %354, %355 : vector<2x32xf32>
    %357 = math.tanh %356 : vector<2x32xf32>
    %358 = arith.mulf %353, %357 : vector<2x32xf32>
    %359 = tpu.concatenate %336, %315 in 1 : vector<2x32xf32>, vector<2x32xf32> -> vector<2x64xf32>
    %cst_83 = arith.constant dense<0.000000e+00> : vector<2x128xf32>
    %360 = tpu.matmul %359, %8, %cst_83 {dimension_numbers = #tpu.dot_dimension_numbers<[1], [0], [0], [1], [0, 0, 1, 1], [], []>} : vector<2x64xf32>, vector<64x128xf32>, vector<2x128xf32> -> vector<2x128xf32>
    %361 = vector.broadcast %10 : vector<1x128xf32> to vector<2x128xf32>
    %362 = arith.addf %360, %361 : vector<2x128xf32>
    %363 = arith.negf %362 : vector<2x128xf32>
    %364 = math.exp %363 : vector<2x128xf32>
    %cst_84 = arith.constant 1.000000e+00 : f32
    %365 = vector.broadcast %cst_84 : f32 to vector<2x128xf32>
    %366 = arith.addf %365, %364 : vector<2x128xf32>
    %367 = arith.divf %365, %366 : vector<2x128xf32>
    %368 = vector.extract_strided_slice %367 {offsets = [0, 0], sizes = [2, 32], strides = [1, 1]} : vector<2x128xf32> to vector<2x32xf32>
    %369 = vector.extract_strided_slice %367 {offsets = [0, 32], sizes = [2, 32], strides = [1, 1]} : vector<2x128xf32> to vector<2x32xf32>
    %370 = vector.extract_strided_slice %367 {offsets = [0, 64], sizes = [2, 32], strides = [1, 1]} : vector<2x128xf32> to vector<2x32xf32>
    %cst_85 = arith.constant 2.000000e+00 : f32
    %371 = vector.broadcast %cst_85 : f32 to vector<2x32xf32>
    %372 = arith.mulf %371, %370 : vector<2x32xf32>
    %cst_86 = arith.constant 1.000000e+00 : f32
    %373 = vector.broadcast %cst_86 : f32 to vector<2x32xf32>
    %374 = arith.subf %372, %373 : vector<2x32xf32>
    %375 = vector.extract_strided_slice %367 {offsets = [0, 96], sizes = [2, 32], strides = [1, 1]} : vector<2x128xf32> to vector<2x32xf32>
    %376 = arith.mulf %369, %313 : vector<2x32xf32>
    %377 = arith.mulf %368, %374 : vector<2x32xf32>
    %378 = arith.addf %376, %377 : vector<2x32xf32>
    %379 = math.tanh %378 : vector<2x32xf32>
    %380 = arith.mulf %375, %379 : vector<2x32xf32>
    %c12 = arith.constant 12 : index
    %c0_87 = arith.constant 0 : index
    %381 = vector.load %arg3[%c12, %c0_87] : memref<16x128xf32, #tpu.memory_space<vmem>>, vector<2x128xf32>
    %cst_88 = arith.constant dense<0.000000e+00> : vector<2x128xf32>
    %382 = tpu.matmul %336, %7, %cst_88 {dimension_numbers = #tpu.dot_dimension_numbers<[1], [0], [0], [1], [0, 0, 1, 1], [], []>} : vector<2x32xf32>, vector<32x128xf32>, vector<2x128xf32> -> vector<2x128xf32>
    %383 = arith.addf %381, %382 : vector<2x128xf32>
    %384 = arith.negf %383 : vector<2x128xf32>
    %385 = math.exp %384 : vector<2x128xf32>
    %cst_89 = arith.constant 1.000000e+00 : f32
    %386 = vector.broadcast %cst_89 : f32 to vector<2x128xf32>
    %387 = arith.addf %386, %385 : vector<2x128xf32>
    %388 = arith.divf %386, %387 : vector<2x128xf32>
    %389 = vector.extract_strided_slice %388 {offsets = [0, 0], sizes = [2, 32], strides = [1, 1]} : vector<2x128xf32> to vector<2x32xf32>
    %390 = vector.extract_strided_slice %388 {offsets = [0, 32], sizes = [2, 32], strides = [1, 1]} : vector<2x128xf32> to vector<2x32xf32>
    %391 = vector.extract_strided_slice %388 {offsets = [0, 64], sizes = [2, 32], strides = [1, 1]} : vector<2x128xf32> to vector<2x32xf32>
    %cst_90 = arith.constant 2.000000e+00 : f32
    %392 = vector.broadcast %cst_90 : f32 to vector<2x32xf32>
    %393 = arith.mulf %392, %391 : vector<2x32xf32>
    %cst_91 = arith.constant 1.000000e+00 : f32
    %394 = vector.broadcast %cst_91 : f32 to vector<2x32xf32>
    %395 = arith.subf %393, %394 : vector<2x32xf32>
    %396 = vector.extract_strided_slice %388 {offsets = [0, 96], sizes = [2, 32], strides = [1, 1]} : vector<2x128xf32> to vector<2x32xf32>
    %397 = arith.mulf %390, %334 : vector<2x32xf32>
    %398 = arith.mulf %389, %395 : vector<2x32xf32>
    %399 = arith.addf %397, %398 : vector<2x32xf32>
    %400 = math.tanh %399 : vector<2x32xf32>
    %401 = arith.mulf %396, %400 : vector<2x32xf32>
    %402 = tpu.concatenate %380, %358 in 1 : vector<2x32xf32>, vector<2x32xf32> -> vector<2x64xf32>
    %cst_92 = arith.constant dense<0.000000e+00> : vector<2x128xf32>
    %403 = tpu.matmul %402, %9, %cst_92 {dimension_numbers = #tpu.dot_dimension_numbers<[1], [0], [0], [1], [0, 0, 1, 1], [], []>} : vector<2x64xf32>, vector<64x128xf32>, vector<2x128xf32> -> vector<2x128xf32>
    %404 = vector.broadcast %11 : vector<1x128xf32> to vector<2x128xf32>
    %405 = arith.addf %403, %404 : vector<2x128xf32>
    %406 = arith.negf %405 : vector<2x128xf32>
    %407 = math.exp %406 : vector<2x128xf32>
    %cst_93 = arith.constant 1.000000e+00 : f32
    %408 = vector.broadcast %cst_93 : f32 to vector<2x128xf32>
    %409 = arith.addf %408, %407 : vector<2x128xf32>
    %410 = arith.divf %408, %409 : vector<2x128xf32>
    %411 = vector.extract_strided_slice %410 {offsets = [0, 0], sizes = [2, 32], strides = [1, 1]} : vector<2x128xf32> to vector<2x32xf32>
    %412 = vector.extract_strided_slice %410 {offsets = [0, 32], sizes = [2, 32], strides = [1, 1]} : vector<2x128xf32> to vector<2x32xf32>
    %413 = vector.extract_strided_slice %410 {offsets = [0, 64], sizes = [2, 32], strides = [1, 1]} : vector<2x128xf32> to vector<2x32xf32>
    %cst_94 = arith.constant 2.000000e+00 : f32
    %414 = vector.broadcast %cst_94 : f32 to vector<2x32xf32>
    %415 = arith.mulf %414, %413 : vector<2x32xf32>
    %cst_95 = arith.constant 1.000000e+00 : f32
    %416 = vector.broadcast %cst_95 : f32 to vector<2x32xf32>
    %417 = arith.subf %415, %416 : vector<2x32xf32>
    %418 = vector.extract_strided_slice %410 {offsets = [0, 96], sizes = [2, 32], strides = [1, 1]} : vector<2x128xf32> to vector<2x32xf32>
    %419 = arith.mulf %412, %356 : vector<2x32xf32>
    %420 = arith.mulf %411, %417 : vector<2x32xf32>
    %421 = arith.addf %419, %420 : vector<2x32xf32>
    %422 = math.tanh %421 : vector<2x32xf32>
    %423 = arith.mulf %418, %422 : vector<2x32xf32>
    %424 = tpu.concatenate %401, %380 in 1 : vector<2x32xf32>, vector<2x32xf32> -> vector<2x64xf32>
    %cst_96 = arith.constant dense<0.000000e+00> : vector<2x128xf32>
    %425 = tpu.matmul %424, %8, %cst_96 {dimension_numbers = #tpu.dot_dimension_numbers<[1], [0], [0], [1], [0, 0, 1, 1], [], []>} : vector<2x64xf32>, vector<64x128xf32>, vector<2x128xf32> -> vector<2x128xf32>
    %426 = vector.broadcast %10 : vector<1x128xf32> to vector<2x128xf32>
    %427 = arith.addf %425, %426 : vector<2x128xf32>
    %428 = arith.negf %427 : vector<2x128xf32>
    %429 = math.exp %428 : vector<2x128xf32>
    %cst_97 = arith.constant 1.000000e+00 : f32
    %430 = vector.broadcast %cst_97 : f32 to vector<2x128xf32>
    %431 = arith.addf %430, %429 : vector<2x128xf32>
    %432 = arith.divf %430, %431 : vector<2x128xf32>
    %433 = vector.extract_strided_slice %432 {offsets = [0, 0], sizes = [2, 32], strides = [1, 1]} : vector<2x128xf32> to vector<2x32xf32>
    %434 = vector.extract_strided_slice %432 {offsets = [0, 32], sizes = [2, 32], strides = [1, 1]} : vector<2x128xf32> to vector<2x32xf32>
    %435 = vector.extract_strided_slice %432 {offsets = [0, 64], sizes = [2, 32], strides = [1, 1]} : vector<2x128xf32> to vector<2x32xf32>
    %cst_98 = arith.constant 2.000000e+00 : f32
    %436 = vector.broadcast %cst_98 : f32 to vector<2x32xf32>
    %437 = arith.mulf %436, %435 : vector<2x32xf32>
    %cst_99 = arith.constant 1.000000e+00 : f32
    %438 = vector.broadcast %cst_99 : f32 to vector<2x32xf32>
    %439 = arith.subf %437, %438 : vector<2x32xf32>
    %440 = vector.extract_strided_slice %432 {offsets = [0, 96], sizes = [2, 32], strides = [1, 1]} : vector<2x128xf32> to vector<2x32xf32>
    %441 = arith.mulf %434, %378 : vector<2x32xf32>
    %442 = arith.mulf %433, %439 : vector<2x32xf32>
    %443 = arith.addf %441, %442 : vector<2x32xf32>
    %444 = math.tanh %443 : vector<2x32xf32>
    %445 = arith.mulf %440, %444 : vector<2x32xf32>
    %c14 = arith.constant 14 : index
    %c0_100 = arith.constant 0 : index
    %446 = vector.load %arg3[%c14, %c0_100] : memref<16x128xf32, #tpu.memory_space<vmem>>, vector<2x128xf32>
    %cst_101 = arith.constant dense<0.000000e+00> : vector<2x128xf32>
    %447 = tpu.matmul %401, %7, %cst_101 {dimension_numbers = #tpu.dot_dimension_numbers<[1], [0], [0], [1], [0, 0, 1, 1], [], []>} : vector<2x32xf32>, vector<32x128xf32>, vector<2x128xf32> -> vector<2x128xf32>
    %448 = arith.addf %446, %447 : vector<2x128xf32>
    %449 = arith.negf %448 : vector<2x128xf32>
    %450 = math.exp %449 : vector<2x128xf32>
    %cst_102 = arith.constant 1.000000e+00 : f32
    %451 = vector.broadcast %cst_102 : f32 to vector<2x128xf32>
    %452 = arith.addf %451, %450 : vector<2x128xf32>
    %453 = arith.divf %451, %452 : vector<2x128xf32>
    %454 = vector.extract_strided_slice %453 {offsets = [0, 0], sizes = [2, 32], strides = [1, 1]} : vector<2x128xf32> to vector<2x32xf32>
    %455 = vector.extract_strided_slice %453 {offsets = [0, 32], sizes = [2, 32], strides = [1, 1]} : vector<2x128xf32> to vector<2x32xf32>
    %456 = vector.extract_strided_slice %453 {offsets = [0, 64], sizes = [2, 32], strides = [1, 1]} : vector<2x128xf32> to vector<2x32xf32>
    %cst_103 = arith.constant 2.000000e+00 : f32
    %457 = vector.broadcast %cst_103 : f32 to vector<2x32xf32>
    %458 = arith.mulf %457, %456 : vector<2x32xf32>
    %cst_104 = arith.constant 1.000000e+00 : f32
    %459 = vector.broadcast %cst_104 : f32 to vector<2x32xf32>
    %460 = arith.subf %458, %459 : vector<2x32xf32>
    %461 = vector.extract_strided_slice %453 {offsets = [0, 96], sizes = [2, 32], strides = [1, 1]} : vector<2x128xf32> to vector<2x32xf32>
    %462 = arith.mulf %455, %399 : vector<2x32xf32>
    %463 = arith.mulf %454, %460 : vector<2x32xf32>
    %464 = arith.addf %462, %463 : vector<2x32xf32>
    %465 = math.tanh %464 : vector<2x32xf32>
    %466 = arith.mulf %461, %465 : vector<2x32xf32>
    %467 = tpu.concatenate %445, %423 in 1 : vector<2x32xf32>, vector<2x32xf32> -> vector<2x64xf32>
    %cst_105 = arith.constant dense<0.000000e+00> : vector<2x128xf32>
    %468 = tpu.matmul %467, %9, %cst_105 {dimension_numbers = #tpu.dot_dimension_numbers<[1], [0], [0], [1], [0, 0, 1, 1], [], []>} : vector<2x64xf32>, vector<64x128xf32>, vector<2x128xf32> -> vector<2x128xf32>
    %469 = vector.broadcast %11 : vector<1x128xf32> to vector<2x128xf32>
    %470 = arith.addf %468, %469 : vector<2x128xf32>
    %471 = arith.negf %470 : vector<2x128xf32>
    %472 = math.exp %471 : vector<2x128xf32>
    %cst_106 = arith.constant 1.000000e+00 : f32
    %473 = vector.broadcast %cst_106 : f32 to vector<2x128xf32>
    %474 = arith.addf %473, %472 : vector<2x128xf32>
    %475 = arith.divf %473, %474 : vector<2x128xf32>
    %476 = vector.extract_strided_slice %475 {offsets = [0, 0], sizes = [2, 32], strides = [1, 1]} : vector<2x128xf32> to vector<2x32xf32>
    %477 = vector.extract_strided_slice %475 {offsets = [0, 32], sizes = [2, 32], strides = [1, 1]} : vector<2x128xf32> to vector<2x32xf32>
    %478 = vector.extract_strided_slice %475 {offsets = [0, 64], sizes = [2, 32], strides = [1, 1]} : vector<2x128xf32> to vector<2x32xf32>
    %cst_107 = arith.constant 2.000000e+00 : f32
    %479 = vector.broadcast %cst_107 : f32 to vector<2x32xf32>
    %480 = arith.mulf %479, %478 : vector<2x32xf32>
    %cst_108 = arith.constant 1.000000e+00 : f32
    %481 = vector.broadcast %cst_108 : f32 to vector<2x32xf32>
    %482 = arith.subf %480, %481 : vector<2x32xf32>
    %483 = vector.extract_strided_slice %475 {offsets = [0, 96], sizes = [2, 32], strides = [1, 1]} : vector<2x128xf32> to vector<2x32xf32>
    %484 = arith.mulf %477, %421 : vector<2x32xf32>
    %485 = arith.mulf %476, %482 : vector<2x32xf32>
    %486 = arith.addf %484, %485 : vector<2x32xf32>
    %487 = math.tanh %486 : vector<2x32xf32>
    %488 = arith.mulf %483, %487 : vector<2x32xf32>
    %489 = tpu.concatenate %466, %445 in 1 : vector<2x32xf32>, vector<2x32xf32> -> vector<2x64xf32>
    %cst_109 = arith.constant dense<0.000000e+00> : vector<2x128xf32>
    %490 = tpu.matmul %489, %8, %cst_109 {dimension_numbers = #tpu.dot_dimension_numbers<[1], [0], [0], [1], [0, 0, 1, 1], [], []>} : vector<2x64xf32>, vector<64x128xf32>, vector<2x128xf32> -> vector<2x128xf32>
    %491 = vector.broadcast %10 : vector<1x128xf32> to vector<2x128xf32>
    %492 = arith.addf %490, %491 : vector<2x128xf32>
    %493 = arith.negf %492 : vector<2x128xf32>
    %494 = math.exp %493 : vector<2x128xf32>
    %cst_110 = arith.constant 1.000000e+00 : f32
    %495 = vector.broadcast %cst_110 : f32 to vector<2x128xf32>
    %496 = arith.addf %495, %494 : vector<2x128xf32>
    %497 = arith.divf %495, %496 : vector<2x128xf32>
    %498 = vector.extract_strided_slice %497 {offsets = [0, 0], sizes = [2, 32], strides = [1, 1]} : vector<2x128xf32> to vector<2x32xf32>
    %499 = vector.extract_strided_slice %497 {offsets = [0, 32], sizes = [2, 32], strides = [1, 1]} : vector<2x128xf32> to vector<2x32xf32>
    %500 = vector.extract_strided_slice %497 {offsets = [0, 64], sizes = [2, 32], strides = [1, 1]} : vector<2x128xf32> to vector<2x32xf32>
    %cst_111 = arith.constant 2.000000e+00 : f32
    %501 = vector.broadcast %cst_111 : f32 to vector<2x32xf32>
    %502 = arith.mulf %501, %500 : vector<2x32xf32>
    %cst_112 = arith.constant 1.000000e+00 : f32
    %503 = vector.broadcast %cst_112 : f32 to vector<2x32xf32>
    %504 = arith.subf %502, %503 : vector<2x32xf32>
    %505 = vector.extract_strided_slice %497 {offsets = [0, 96], sizes = [2, 32], strides = [1, 1]} : vector<2x128xf32> to vector<2x32xf32>
    %506 = arith.mulf %499, %443 : vector<2x32xf32>
    %507 = arith.mulf %498, %504 : vector<2x32xf32>
    %508 = arith.addf %506, %507 : vector<2x32xf32>
    %509 = math.tanh %508 : vector<2x32xf32>
    %510 = arith.mulf %505, %509 : vector<2x32xf32>
    %511 = tpu.concatenate %510, %488 in 1 : vector<2x32xf32>, vector<2x32xf32> -> vector<2x64xf32>
    %cst_113 = arith.constant dense<0.000000e+00> : vector<2x128xf32>
    %512 = tpu.matmul %511, %9, %cst_113 {dimension_numbers = #tpu.dot_dimension_numbers<[1], [0], [0], [1], [0, 0, 1, 1], [], []>} : vector<2x64xf32>, vector<64x128xf32>, vector<2x128xf32> -> vector<2x128xf32>
    %513 = vector.broadcast %11 : vector<1x128xf32> to vector<2x128xf32>
    %514 = arith.addf %512, %513 : vector<2x128xf32>
    %515 = arith.negf %514 : vector<2x128xf32>
    %516 = math.exp %515 : vector<2x128xf32>
    %cst_114 = arith.constant 1.000000e+00 : f32
    %517 = vector.broadcast %cst_114 : f32 to vector<2x128xf32>
    %518 = arith.addf %517, %516 : vector<2x128xf32>
    %519 = arith.divf %517, %518 : vector<2x128xf32>
    %520 = vector.extract_strided_slice %519 {offsets = [0, 0], sizes = [2, 32], strides = [1, 1]} : vector<2x128xf32> to vector<2x32xf32>
    %521 = vector.extract_strided_slice %519 {offsets = [0, 32], sizes = [2, 32], strides = [1, 1]} : vector<2x128xf32> to vector<2x32xf32>
    %522 = vector.extract_strided_slice %519 {offsets = [0, 64], sizes = [2, 32], strides = [1, 1]} : vector<2x128xf32> to vector<2x32xf32>
    %cst_115 = arith.constant 2.000000e+00 : f32
    %523 = vector.broadcast %cst_115 : f32 to vector<2x32xf32>
    %524 = arith.mulf %523, %522 : vector<2x32xf32>
    %cst_116 = arith.constant 1.000000e+00 : f32
    %525 = vector.broadcast %cst_116 : f32 to vector<2x32xf32>
    %526 = arith.subf %524, %525 : vector<2x32xf32>
    %527 = vector.extract_strided_slice %519 {offsets = [0, 96], sizes = [2, 32], strides = [1, 1]} : vector<2x128xf32> to vector<2x32xf32>
    %528 = arith.mulf %521, %486 : vector<2x32xf32>
    %529 = arith.mulf %520, %526 : vector<2x32xf32>
    %530 = arith.addf %528, %529 : vector<2x32xf32>
    %531 = math.tanh %530 : vector<2x32xf32>
    %532 = arith.mulf %527, %531 : vector<2x32xf32>
    %c200 = arith.constant 200 : index
    %c0_117 = arith.constant 0 : index
    %533 = vector.load %arg1[%c200, %c0_117] : memref<248x128xf32, #tpu.memory_space<vmem>>, vector<32x128xf32>
    %cst_118 = arith.constant dense<0.000000e+00> : vector<2x128xf32>
    %534 = tpu.matmul %532, %533, %cst_118 {dimension_numbers = #tpu.dot_dimension_numbers<[1], [0], [0], [1], [0, 0, 1, 1], [], []>} : vector<2x32xf32>, vector<32x128xf32>, vector<2x128xf32> -> vector<2x128xf32>
    %c232 = arith.constant 232 : index
    %c0_119 = arith.constant 0 : index
    %535 = vector.load %arg1[%c232, %c0_119] : memref<248x128xf32, #tpu.memory_space<vmem>>, vector<1x128xf32>
    %536 = vector.broadcast %535 : vector<1x128xf32> to vector<2x128xf32>
    %537 = arith.addf %534, %536 : vector<2x128xf32>
    %538 = math.tanh %537 : vector<2x128xf32>
    %c240 = arith.constant 240 : index
    %c0_120 = arith.constant 0 : index
    %539 = vector.load %arg1[%c240, %c0_120] : memref<248x128xf32, #tpu.memory_space<vmem>>, vector<1x128xf32>
    %540 = vector.broadcast %539 : vector<1x128xf32> to vector<2x128xf32>
    %541 = arith.mulf %538, %540 : vector<2x128xf32>
    %cst_121 = arith.constant dense<0.000000e+00> : vector<2xf32>
    %542 = vector.multi_reduction <add>, %541, %cst_121 [1] : vector<2x128xf32> to vector<2xf32>
    %543 = vector.shape_cast %542 : vector<2xf32> to vector<2x1xf32>
    %544 = vector.extract_strided_slice %539 {offsets = [0, 16], sizes = [1, 1], strides = [1, 1]} : vector<1x128xf32> to vector<1x1xf32>
    %545 = vector.broadcast %544 : vector<1x1xf32> to vector<2x1xf32>
    %546 = arith.addf %543, %545 : vector<2x1xf32>
    %c0_122 = arith.constant 0 : index
    %c0_123 = arith.constant 0 : index
    %547 = vector.load %arg2[%c0_122, %c0_123] : memref<2x1xf32, #tpu.memory_space<vmem>>, vector<2x1xf32>
    tpu.vector_store %arg2[%c0_122, %c0_123], %546 {strides = array<i32>} : memref<2x1xf32, #tpu.memory_space<vmem>>, vector<2x1xf32>,
    return
  }
}

</mosaic_0001>

<bundles_post_ra>
// kernel: tpu_custom_call.1
= control target key start
LH: loop header
LB: loop body
LE: loop exit
PB: predicated region body
PF: predicated region fallthrough
CT: control target
= control target key end

     0   :  { %7 = vsyncpa [#allocation4], 0  ;;  %s2593_s0 = inlined_call_operand.hbm [shape: f32[16,16], index: 0, kind: input, shape index: {}]   ;;  %s2594_s1 = inlined_call_operand.hbm [shape: f32[248,128], index: 1, kind: input, shape index: {}]   ;;  %s2595_s2 = inlined_call_operand.vmem [shape: f32[2,1], index: 2, kind: output, shape index: {}]  }
   0x1   :  { %s13_s11 = sshll.u32 %s2593_s0, 4  ;;  %s14_s11 = int_to_ptr.hbm [resolvable:$true] %s13_s11 }
   0x2   :  { %8 = vsyncpa [#allocation6], 0  ;;  %s2060_s12 = smov [#allocation3]   ;;  %s26_s16 = sshll.u32 %s2594_s1, 4  ;;  %s27_s16 = int_to_ptr.hbm [resolvable:$true] %s26_s16 }
   0x3   :  { %s15_s13 = sshll.u32 %s2060_s12, 4  ;;  %s2061_s17 = smov 128   ;;  %s16_s13 = int_to_ptr.vmem [resolvable:$true] %s15_s13 }
   0x4   :  { %s2062_s18 = smov 8   ;;  %s2063_s19 = smov [#allocation5]  }
   0x5   :  { %21 = dma.hbm_to_vmem [thread:$0]  %s14_s11, 256, %s16_s13, [#allocation4], %s2061_s17, %s2061_s17, %s2062_s18  }
   0x6   :  { %s28_s20 = sshll.u32 %s2063_s19, 4  ;;  %s29_s20 = int_to_ptr.vmem [resolvable:$true] %s28_s20 }
   0x7   :  { %34 = dma.hbm_to_vmem [thread:$0]  %s27_s16, 3968, %s29_s20, [#allocation6], %s2061_s17, %s2061_s17, %s2062_s18  }
   0x8   :  { %2056 = dma.done.wait [#allocation4], 256  }
   0x9   :  { %2057 = vsyncadd [#allocation4], 4294967040 }
   0xa   :  { %2058 = dma.done.wait [#allocation6], 3968  }
   0xb   :  { %2059 = vsyncadd [#allocation6], 4294963328  ;;  %v46_v0 = vld [vmem:[#allocation5 + $0x8] sm:$0xff]  ;;  %v45_v1 = vld [vmem:[#allocation5] sm:$0xff]  ;;  %vm49_vm0 = vcmask 130048   ;;  %v2064_v7 = vmov 0.0  }
   0xc   :  { %70 = vmatpush.msra.mxu0 %v46_v0  ;;  %v43_v2 = vld [vmem:[#allocation3] sm:$0xff]  ;;  %v2089_v3 = vld [vmem:[#allocation5 + $0x28] sm:$0xff]  ;;  %v2091_v4 = vld [vmem:[#allocation5 + $0x20] sm:$0xff]  ;;  %s2065_s0 = smov 64   ;;  %s2066_s1 = smov 32   ;;  %vm104_vm5 = vcmask 261120  }
   0xd   :  { %120 = vmatpush.msra.mxu1 %v2089_v3  ;;  %v2094_v5 = vld [vmem:[#allocation5 + $0x18] sm:$0xff]  ;;  %250 = vmatpush.msra.mxu3 %v2089_v3  ;;  %v2099_v6 = vld [vmem:[#allocation5 + $0x10] sm:$0xff]  ;;  %v2119_v35 = vld [vmem:[#allocation5 + $0x68] sm:$0xff]  ;;  %vm173_vm6 = vcmask 523264   ;;  %s2067_s21 = smov 112  }
   0xe   :  { %71 = vmatpush.msra.mxu0 %v45_v1  ;;  %v2110_v8 = vld [vmem:[#allocation5 + $0xb0] ss:$0 sm:$0xff]  ;;  %v2121_v36 = vld [vmem:[#allocation5 + $0x60] sm:$0xff]  ;;  %185 = vmatpush.msra.mxu2 %v2119_v35  ;;  %v2125_v37 = vld [vmem:[#allocation5 + $0x58] sm:$0xff] }
   0xf   :  { %1761 = vmatmul.msk.f32.vlgmr.msra.gmra.mxu0 %vm49_vm0, %v43_v2  ;;  %121 = vmatpush.msra.mxu1 %v2091_v4  ;;  %v2129_v38 = vld [vmem:[#allocation5 + $0x50] sm:$0xff]  ;;  %v2133_v39 = vld [vmem:[#allocation5 + $0x48] sm:$0xff]  ;;  %v2137_v40 = vld [vmem:[#allocation5 + $0x40] sm:$0xff] }
  0x10   :  { %251 = vmatpush.msra.mxu3 %v2091_v4  ;;  %186 = vmatpush.msra.mxu2 %v2121_v36  ;;  %v2141_v41 = vld [vmem:[#allocation5 + $0x38] sm:$0xff]  ;;  %v2148_v44 = vld [vmem:[#allocation5 + $0x30] sm:$0xff] }
  0x11   :  { %122 = vmatpush.msra.mxu1 %v2094_v5  ;;  %v2163_v47 = vld [vmem:[#allocation5 + $0xb8] ss:$0 sm:$0xff] }
  0x12   :  { %252 = vmatpush.msra.mxu3 %v2094_v5  ;;  %187 = vmatpush.msra.mxu2 %v2125_v37 }
  0x13   :  { %123 = vmatpush.msra.mxu1 %v2099_v6 }
  0x14   :  { %124 = vmatmul.f32.vlgmr.msra.gmra.mxu1 %v2064_v7  ;;  %253 = vmatpush.msra.mxu3 %v2099_v6 }
  0x15   :  { %383 = vmatpush.msrb.mxu1 %v2119_v35  ;;  %188 = vmatpush.msra.mxu2 %v2129_v38 }
  0x16   :  { %448 = vmatpush.msrb.mxu3 %v2089_v3 }
  0x17   :  { %384 = vmatpush.msrb.mxu1 %v2121_v36  ;;  %189 = vmatpush.msra.mxu2 %v2133_v39 }
  0x18   :  { %449 = vmatpush.msrb.mxu3 %v2091_v4 }
  0x19   :  { %385 = vmatpush.msrb.mxu1 %v2125_v37  ;;  %190 = vmatpush.msra.mxu2 %v2137_v40 }
  0x1a   :  { %450 = vmatpush.msrb.mxu3 %v2094_v5 }
  0x1b   :  { %386 = vmatpush.msrb.mxu1 %v2129_v38  ;;  %191 = vmatpush.msra.mxu2 %v2141_v41 }
  0x1c   :  { %451 = vmatpush.msrb.mxu3 %v2099_v6 }
  0x1d   :  { %387 = vmatpush.msrb.mxu1 %v2133_v39  ;;  %192 = vmatpush.msra.mxu2 %v2148_v44 }
  0x1f   :  { %388 = vmatpush.msrb.mxu1 %v2137_v40 }
  0x21   :  { %389 = vmatpush.msrb.mxu1 %v2141_v41 }
  0x23   :  { %390 = vmatpush.msrb.mxu1 %v2148_v44 }
  0x8c   :  { %v73_v9 = vpop.f32.mrf.mxu0 }
  0x8d   :  { %v74_v10 = vadd.f32 %v2110_v8, %v73_v9 }
  0x8f   :  { %79 = vst [vmem:[#allocation2] sm:$0xff] %v74_v10 }
  0x91   :  { %v125_v11 = vpop.f32.mrf.mxu1 }
  0x96   :  { %v103_v12 = vld [vmem:[#allocation2] sm:$0x3]  ;;  %v235_v48 = vld [vmem:[#allocation2 + $0x2] sm:$0x3] }
  0x97   :  { %v128_v13 = vadd.f32 %v125_v11, %v103_v12 }
  0x99   :  { %v1763_v14 = vmul.f32 -1.442695, %v128_v13 }
  0x9b   :  { %1848 = vpow2.f32 %v1763_v14 }
  0xa1   :  { %v1849_v15 = vpop.eup %1848 }
  0xa2   :  { %v132_v16 = vadd.f32 1.0, %v1849_v15 }
  0xa4   :  { %1850 = vrcp.f32 %v132_v16  ;;  %v144_v20 = vand.u32 2147483648, %v132_v16  ;;  %v142_v22 = vand.u32 2147483647, %v132_v16  ;;  %vm138_vm2 = vweird.f32 %v132_v16 }
  0xa6   :  { %v145_v24 = vor.u32 1.1754944e-38, %v144_v20  ;;  %vm143_vm4 = vcmp.eq.f32.partialorder %v142_v22, 8.507059e+37 }
  0xaa   :  { %v1851_v17 = vpop.eup %1850 }
  0xab   :  { %v134_v18 = vmul.f32 %v1851_v17, %v132_v16  ;;  %vm139_vm1 = vweird.f32 %v1851_v17 }
  0xac   :  { %vm140_vm3 = vmor %vm138_vm2, %vm139_vm1 }
  0xad   :  { %v135_v19 = vsub.f32 1.0, %v134_v18 }
  0xaf   :  { %v136_v21 = vmul.f32 %v1851_v17, %v135_v19 }
  0xb1   :  { %v137_v23 = vadd.f32 %v1851_v17, %v136_v21 }
  0xb3   :  { %v141_v25 = vsel %vm140_vm3, %v1851_v17, %v137_v23 }
  0xb4   :  { %v146_v26 = vsel %vm143_vm4, %v145_v24, %v141_v25 }
  0xb5   :  { %v148_v27 = vmul.f32 2.0, %v146_v26  ;;  %v150_v31 = vmul.f32 0.0, %v146_v26 }
  0xb7   :  { %v1764_v28 = vadd.f32 -1.0, %v148_v27 }
  0xb9   :  { %152 = vrot.lane.b32.xlu0 %v1764_v28, %s2065_s0 }
 0x12b   :  { %v153_v29 = vpop.permute.xlu0 %152 }
 0x12c   :  { %v155_v30 = vmul.f32 %v153_v29, %v146_v26 }
 0x12e   :  { %157 = vrot.lane.b32.xlu0 %v155_v30, %s2066_s1 }
 0x1a0   :  { %v158_v32 = vpop.permute.xlu0 %157 }
 0x1a1   :  { %v2115_v33 = vadd.f32 %v158_v32, %v150_v31 }
 0x1a3   :  { %1852 = vtanh.f32 %v2115_v33 }
 0x1a9   :  { %v1853_v34 = vpop.eup %1852 }
 0x1aa   :  { %163 = vrot.lane.b32.xlu1 %v1853_v34, %s2065_s0 }
 0x21c   :  { %v164_v42 = vpop.permute.xlu1 %163 }
 0x21d   :  { %v166_v43 = vmul.f32 %v164_v42, %v146_v26 }
 0x21f   :  { %168 = vrot.lane.b32.xlu1 %v166_v43, %s2066_s1 }
 0x291   :  { %v169_v45 = vpop.permute.xlu1 %168 }
 0x292   :  { %1768 = vmatmul.msk.f32.vlgmr.msra.gmra.mxu3 %vm104_vm5, %v169_v45  ;;  %v171_v46 = vsel %vm104_vm5, %v169_v45, 0.0 }
 0x293   :  { %1765 = vmatmul.msk.f32.vlgmr.msra.gmra.mxu2 %vm173_vm6, %v171_v46  ;;  %584 = vmatpush.msra.mxu3 %v2119_v35 }
 0x295   :  { %585 = vmatpush.msra.mxu3 %v2121_v36 }
 0x297   :  { %586 = vmatpush.msra.mxu3 %v2125_v37 }
 0x299   :  { %587 = vmatpush.msra.mxu3 %v2129_v38 }
 0x29b   :  { %588 = vmatpush.msra.mxu3 %v2133_v39 }
 0x29d   :  { %589 = vmatpush.msra.mxu3 %v2137_v40 }
 0x29f   :  { %590 = vmatpush.msra.mxu3 %v2141_v41 }
 0x2a1   :  { %591 = vmatpush.msra.mxu3 %v2148_v44 }
 0x315   :  { %v255_v49 = vpop.f32.mrf.mxu3 }
 0x316   :  { %v258_v50 = vadd.f32 %v255_v49, %v235_v48  ;;  %v194_v51 = vpop.f32.mrf.mxu2  ;;  %v2182_v49 = vld [vmem:[#allocation5 + $0xa8] sm:$0xff] }
 0x317   :  { %v195_v52 = vadd.f32 %v2163_v47, %v194_v51  ;;  %314 = vmatpush.msrb.mxu0 %v2182_v49  ;;  %v44_v51 = vld [vmem:[#allocation3 + $0x8] sm:$0xff]  ;;  %515 = vmatpush.msrb.mxu2 %v2182_v49 }
 0x318   :  { %v1769_v53 = vmul.f32 -1.442695, %v258_v50  ;;  %v2184_v50 = vld [vmem:[#allocation5 + $0xa0] sm:$0xff]  ;;  %1762 = vmatmul.msk.f32.gmra.mxu0 %vm49_vm0, %v44_v51  ;;  %716 = vmatpush.msra.mxu1 %v2182_v49 }
 0x319   :  { %v1766_v54 = vmul.f32 -1.442695, %v195_v52  ;;  %v2188_v52 = vld [vmem:[#allocation5 + $0x98] sm:$0xff]  ;;  %315 = vmatpush.msrb.mxu0 %v2184_v50  ;;  %516 = vmatpush.msrb.mxu2 %v2184_v50 }
 0x31a   :  { %1854 = vpow2.f32 %v1769_v53  ;;  %v2194_v53 = vld [vmem:[#allocation5 + $0x90] sm:$0xff]  ;;  %717 = vmatpush.msra.mxu1 %v2184_v50 }
 0x31b   :  { %1856 = vpow2.f32 %v1766_v54  ;;  %316 = vmatpush.msrb.mxu0 %v2188_v52  ;;  %517 = vmatpush.msrb.mxu2 %v2188_v52  ;;  %v2199_v54 = vld [vmem:[#allocation5 + $0x88] sm:$0xff] }
 0x31c   :  { %718 = vmatpush.msra.mxu1 %v2188_v52 }
 0x31d   :  { %317 = vmatpush.msrb.mxu0 %v2194_v53  ;;  %518 = vmatpush.msrb.mxu2 %v2194_v53 }
 0x31e   :  { %719 = vmatpush.msra.mxu1 %v2194_v53 }
 0x31f   :  { %318 = vmatpush.msrb.mxu0 %v2199_v54  ;;  %519 = vmatpush.msrb.mxu2 %v2199_v54 }
 0x320   :  { %v1855_v55 = vpop.eup %1854  ;;  %720 = vmatpush.msra.mxu1 %v2199_v54 }
 0x321   :  { %v1857_v56 = vpop.eup %1856  ;;  %v262_v57 = vadd.f32 1.0, %v1855_v55  ;;  %v2204_v55 = vld [vmem:[#allocation5 + $0x80] sm:$0xff] }
 0x322   :  { %v200_v58 = vadd.f32 1.0, %v1857_v56  ;;  %v2209_v56 = vld [vmem:[#allocation5 + $0x78] sm:$0xff]  ;;  %319 = vmatpush.msrb.mxu0 %v2204_v55  ;;  %520 = vmatpush.msrb.mxu2 %v2204_v55 }
 0x323   :  { %1858 = vrcp.f32 %v262_v57  ;;  %v274_v1 = vand.u32 2147483648, %v262_v57  ;;  %v272_v7 = vand.u32 2147483647, %v262_v57  ;;  %vm268_vm8 = vweird.f32 %v262_v57  ;;  %721 = vmatpush.msra.mxu1 %v2204_v55 }
 0x324   :  { %1860 = vrcp.f32 %v200_v58  ;;  %v212_v13 = vand.u32 2147483648, %v200_v58  ;;  %vm206_vm12 = vweird.f32 %v200_v58  ;;  %v210_v15 = vand.u32 2147483647, %v200_v58  ;;  %320 = vmatpush.msrb.mxu0 %v2209_v56  ;;  %521 = vmatpush.msrb.mxu2 %v2209_v56 }
 0x325   :  { %v275_v11 = vor.u32 1.1754944e-38, %v274_v1  ;;  %vm273_vm11 = vcmp.eq.f32.partialorder %v272_v7, 8.507059e+37  ;;  %722 = vmatpush.msra.mxu1 %v2209_v56  ;;  %v433_v1 = vld [vmem:[#allocation2 + $0x4] sm:$0x3] }
 0x326   :  { %v213_v19 = vor.u32 1.1754944e-38, %v212_v13  ;;  %vm211_vm14 = vcmp.eq.f32.partialorder %v210_v15, 8.507059e+37 }
 0x329   :  { %v1859_v59 = vpop.eup %1858 }
 0x32a   :  { %v1861_v60 = vpop.eup %1860  ;;  %v264_v61 = vmul.f32 %v1859_v59, %v262_v57  ;;  %vm269_vm7 = vweird.f32 %v1859_v59 }
 0x32b   :  { %v202_v62 = vmul.f32 %v1861_v60, %v200_v58  ;;  %vm207_vm9 = vweird.f32 %v1861_v60  ;;  %vm270_vm10 = vmor %vm268_vm8, %vm269_vm7  ;;  %v2218_v58 = vld [vmem:[#allocation5 + $0x70] sm:$0xff] }
 0x32c   :  { %v265_v63 = vsub.f32 1.0, %v264_v61  ;;  %vm208_vm13 = vmor %vm206_vm12, %vm207_vm9  ;;  %321 = vmatpush.msrb.mxu0 %v2218_v58  ;;  %522 = vmatpush.msrb.mxu2 %v2218_v58 }
 0x32d   :  { %v203_v0 = vsub.f32 1.0, %v202_v62  ;;  %723 = vmatpush.msra.mxu1 %v2218_v58 }
 0x32e   :  { %v266_v2 = vmul.f32 %v1859_v59, %v265_v63  ;;  %649 = vmatpush.msra.mxu0 %v2089_v3  ;;  %850 = vmatpush.msra.mxu2 %v2089_v3 }
 0x32f   :  { %v204_v9 = vmul.f32 %v1861_v60, %v203_v0 }
 0x330   :  { %v267_v10 = vadd.f32 %v1859_v59, %v266_v2  ;;  %650 = vmatpush.msra.mxu0 %v2091_v4  ;;  %851 = vmatpush.msra.mxu2 %v2091_v4 }
 0x331   :  { %v205_v12 = vadd.f32 %v1861_v60, %v204_v9 }
 0x332   :  { %v271_v14 = vsel %vm270_vm10, %v1859_v59, %v267_v10  ;;  %651 = vmatpush.msra.mxu0 %v2094_v5  ;;  %852 = vmatpush.msra.mxu2 %v2094_v5 }
 0x333   :  { %v276_v16 = vsel %vm273_vm11, %v275_v11, %v271_v14  ;;  %v209_v18 = vsel %vm208_vm13, %v1861_v60, %v205_v12 }
 0x334   :  { %v278_v17 = vmul.f32 2.0, %v276_v16  ;;  %v214_v21 = vsel %vm211_vm14, %v213_v19, %v209_v18  ;;  %v280_v28 = vmul.f32 %v276_v16, %v2115_v33  ;;  %652 = vmatpush.msra.mxu0 %v2099_v6  ;;  %853 = vmatpush.msra.mxu2 %v2099_v6 }
 0x335   :  { %v216_v22 = vmul.f32 2.0, %v214_v21  ;;  %v218_v31 = vmul.f32 0.0, %v214_v21 }
 0x336   :  { %v1770_v20 = vadd.f32 -1.0, %v278_v17 }
 0x337   :  { %v1767_v23 = vadd.f32 -1.0, %v216_v22  ;;  %v2262_v22 = vld [vmem:[#allocation5 + $0xc0] ss:$0 sm:$0xff] }
 0x338   :  { %282 = vrot.lane.b32.xlu2 %v1770_v20, %s2065_s0 }
 0x340   :  { %220 = vrot.lane.b32.xlu2 %v1767_v23, %s2065_s0 }
 0x392   :  { %v283_v24 = vpop.permute.xlu2 %282 }
 0x393   :  { %v285_v25 = vmul.f32 %v283_v24, %v276_v16 }
 0x395   :  { %287 = vrot.lane.b32.xlu0 %v285_v25, %s2066_s1  ;;  %v76_v63 = vpop.f32.mrf.mxu0 }
 0x396   :  { %v77_v0 = vadd.f32 %v2110_v8, %v76_v63 }
 0x398   :  { %80 = vst [vmem:[#allocation2 + $0x8] sm:$0xff] %v77_v0 }
 0x39a   :  { %v221_v26 = vpop.permute.xlu2 %220 }
 0x39b   :  { %v223_v27 = vmul.f32 %v221_v26, %v214_v21 }
 0x39d   :  { %225 = vrot.lane.b32.xlu1 %v223_v27, %s2066_s1 }
 0x407   :  { %v288_v29 = vpop.permute.xlu0 %287 }
 0x408   :  { %v2171_v30 = vadd.f32 %v288_v29, %v280_v28 }
 0x40a   :  { %1862 = vtanh.f32 %v2171_v30 }
 0x40f   :  { %v226_v32 = vpop.permute.xlu1 %225 }
 0x410   :  { %v1863_v34 = vpop.eup %1862  ;;  %v2174_v42 = vadd.f32 %v226_v32, %v218_v31 }
 0x411   :  { %293 = vrot.lane.b32.xlu2 %v1863_v34, %s2065_s0 }
 0x412   :  { %1864 = vtanh.f32 %v2174_v42 }
 0x418   :  { %v1865_v43 = vpop.eup %1864 }
 0x419   :  { %231 = vrot.lane.b32.xlu0 %v1865_v43, %s2065_s0 }
 0x46b   :  { %v294_v45 = vpop.permute.xlu2 %293 }
 0x46c   :  { %v296_v46 = vmul.f32 %v294_v45, %v276_v16 }
 0x46e   :  { %365 = vrot.lane.b32.xlu1 %v296_v46, %s2066_s1 }
 0x48b   :  { %v232_v33 = vpop.permute.xlu0 %231 }
 0x48c   :  { %v234_v48 = vmul.f32 %v232_v33, %v214_v21 }
 0x48e   :  { %298 = vrot.lane.b32.xlu0 %v234_v48, %s2066_s1  ;;  %368 = vrot.lane.b32.xlu2 %v234_v48, %s2065_s0 }
 0x4e0   :  { %v366_v57 = vpop.permute.xlu1 %365 }
 0x4e1   :  { %1777 = vmatmul.msk.f32.vlgmr.msrb.gmra.mxu3 %vm104_vm5, %v366_v57 }
 0x4e2   :  { %917 = vmatpush.msrb.mxu3 %v2182_v49 }
 0x4e4   :  { %918 = vmatpush.msrb.mxu3 %v2184_v50 }
 0x4e6   :  { %919 = vmatpush.msrb.mxu3 %v2188_v52 }
 0x4e8   :  { %v369_v59 = vpop.permute.xlu2 %368  ;;  %920 = vmatpush.msrb.mxu3 %v2194_v53 }
 0x4e9   :  { %v371_v60 = vsel %vm104_vm5, %v366_v57, %v369_v59 }
 0x4ea   :  { %1774 = vmatmul.msk.f32.vlgmr.msrb.gmra.mxu1 %vm173_vm6, %v371_v60  ;;  %921 = vmatpush.msrb.mxu3 %v2199_v54 }
 0x4eb   :  { %986 = vmatpush.msrb.mxu1 %v2119_v35 }
 0x4ec   :  { %922 = vmatpush.msrb.mxu3 %v2204_v55 }
 0x4ed   :  { %987 = vmatpush.msrb.mxu1 %v2121_v36 }
 0x4ee   :  { %923 = vmatpush.msrb.mxu3 %v2209_v56 }
 0x4ef   :  { %988 = vmatpush.msrb.mxu1 %v2125_v37 }
 0x4f0   :  { %924 = vmatpush.msrb.mxu3 %v2218_v58 }
 0x4f1   :  { %989 = vmatpush.msrb.mxu1 %v2129_v38 }
 0x4f3   :  { %990 = vmatpush.msrb.mxu1 %v2133_v39 }
 0x4f5   :  { %991 = vmatpush.msrb.mxu1 %v2137_v40 }
 0x4f7   :  { %992 = vmatpush.msrb.mxu1 %v2141_v41 }
 0x4f9   :  { %993 = vmatpush.msrb.mxu1 %v2148_v44 }
 0x500   :  { %v299_v61 = vpop.permute.xlu0 %298 }
 0x501   :  { %v301_v62 = vsel %vm104_vm5, %v299_v61, 0.0 }
 0x502   :  { %1771 = vmatmul.msk.f32.vlgmr.msrb.gmra.mxu0 %vm173_vm6, %v301_v62 }
 0x503   :  { %785 = vmatpush.msrb.mxu0 %v2119_v35 }
 0x505   :  { %786 = vmatpush.msrb.mxu0 %v2121_v36 }
 0x507   :  { %787 = vmatpush.msrb.mxu0 %v2125_v37 }
 0x509   :  { %788 = vmatpush.msrb.mxu0 %v2129_v38 }
 0x50b   :  { %789 = vmatpush.msrb.mxu0 %v2133_v39 }
 0x50d   :  { %790 = vmatpush.msrb.mxu0 %v2137_v40 }
 0x50f   :  { %791 = vmatpush.msrb.mxu0 %v2141_v41 }
 0x511   :  { %792 = vmatpush.msrb.mxu0 %v2148_v44 }
 0x564   :  { %v453_v2 = vpop.f32.mrf.mxu3 }
 0x565   :  { %v456_v7 = vadd.f32 %v453_v2, %v433_v1 }
 0x567   :  { %v1778_v9 = vmul.f32 -1.442695, %v456_v7  ;;  %v392_v10 = vpop.f32.mrf.mxu1 }
 0x568   :  { %v393_v11 = vadd.f32 %v2163_v47, %v392_v10 }
 0x569   :  { %1866 = vpow2.f32 %v1778_v9 }
 0x56a   :  { %v1775_v12 = vmul.f32 -1.442695, %v393_v11 }
 0x56c   :  { %1868 = vpow2.f32 %v1775_v12 }
 0x56f   :  { %v1867_v13 = vpop.eup %1866 }
 0x570   :  { %v460_v14 = vadd.f32 1.0, %v1867_v13 }
 0x572   :  { %v1869_v15 = vpop.eup %1868  ;;  %1870 = vrcp.f32 %v460_v14  ;;  %v472_v20 = vand.u32 2147483648, %v460_v14  ;;  %v470_v24 = vand.u32 2147483647, %v460_v14  ;;  %vm466_vm0 = vweird.f32 %v460_v14 }
 0x573   :  { %v398_v16 = vadd.f32 1.0, %v1869_v15 }
 0x574   :  { %v473_v28 = vor.u32 1.1754944e-38, %v472_v20  ;;  %vm471_vm3 = vcmp.eq.f32.partialorder %v470_v24, 8.507059e+37 }
 0x575   :  { %1872 = vrcp.f32 %v398_v16  ;;  %v410_v29 = vand.u32 2147483648, %v398_v16  ;;  %v408_v34 = vand.u32 2147483647, %v398_v16  ;;  %vm404_vm4 = vweird.f32 %v398_v16 }
 0x577   :  { %v411_v51 = vor.u32 1.1754944e-38, %v410_v29  ;;  %vm409_vm8 = vcmp.eq.f32.partialorder %v408_v34, 8.507059e+37 }
 0x578   :  { %v1871_v17 = vpop.eup %1870 }
 0x579   :  { %v462_v18 = vmul.f32 %v1871_v17, %v460_v14  ;;  %vm467_vm15 = vweird.f32 %v1871_v17 }
 0x57a   :  { %vm468_vm1 = vmor %vm466_vm0, %vm467_vm15 }
 0x57b   :  { %v1873_v8 = vpop.eup %1872  ;;  %v463_v19 = vsub.f32 1.0, %v462_v18 }
 0x57c   :  { %v400_v21 = vmul.f32 %v1873_v8, %v398_v16  ;;  %vm405_vm2 = vweird.f32 %v1873_v8 }
 0x57d   :  { %v464_v23 = vmul.f32 %v1871_v17, %v463_v19  ;;  %vm406_vm7 = vmor %vm404_vm4, %vm405_vm2 }
 0x57e   :  { %v401_v25 = vsub.f32 1.0, %v400_v21 }
 0x57f   :  { %v323_v26 = vpop.f32.mrf.mxu0  ;;  %v465_v27 = vadd.f32 %v1871_v17, %v464_v23 }
 0x580   :  { %v324_v31 = vadd.f32 %v2262_v22, %v323_v26  ;;  %v402_v32 = vmul.f32 %v1873_v8, %v401_v25 }
 0x581   :  { %v469_v43 = vsel %vm468_vm1, %v1871_v17, %v465_v27 }
 0x582   :  { %v1772_v45 = vmul.f32 -1.442695, %v324_v31  ;;  %v2265_v46 = vsel %vm471_vm3, %v473_v28, %v469_v43  ;;  %v403_v33 = vadd.f32 %v1873_v8, %v402_v32 }
 0x583   :  { %v476_v48 = vmul.f32 2.0, %v2265_v46  ;;  %v478_v28 = vmul.f32 %v2265_v46, %v2171_v30 }
 0x584   :  { %1874 = vpow2.f32 %v1772_v45  ;;  %v407_v57 = vsel %vm406_vm7, %v1873_v8, %v403_v33 }
 0x585   :  { %v1779_v59 = vadd.f32 -1.0, %v476_v48  ;;  %v412_v60 = vsel %vm409_vm8, %v411_v51, %v407_v57 }
 0x586   :  { %v414_v61 = vmul.f32 2.0, %v412_v60  ;;  %v416_v24 = vmul.f32 %v412_v60, %v2174_v42 }
 0x587   :  { %480 = vrot.lane.b32.xlu1 %v1779_v59, %s2065_s0 }
 0x588   :  { %v1776_v62 = vadd.f32 -1.0, %v414_v61 }
 0x58a   :  { %v1875_v63 = vpop.eup %1874  ;;  %418 = vrot.lane.b32.xlu2 %v1776_v62, %s2065_s0 }
 0x58b   :  { %v329_v0 = vadd.f32 1.0, %v1875_v63 }
 0x58d   :  { %1876 = vrcp.f32 %v329_v0  ;;  %v341_v9 = vand.u32 2147483648, %v329_v0  ;;  %v339_v11 = vand.u32 2147483647, %v329_v0  ;;  %vm335_vm10 = vweird.f32 %v329_v0 }
 0x58f   :  { %v342_v13 = vor.u32 1.1754944e-38, %v341_v9  ;;  %vm340_vm12 = vcmp.eq.f32.partialorder %v339_v11, 8.507059e+37 }
 0x593   :  { %v1877_v1 = vpop.eup %1876 }
 0x594   :  { %v331_v2 = vmul.f32 %v1877_v1, %v329_v0  ;;  %vm336_vm9 = vweird.f32 %v1877_v1 }
 0x595   :  { %vm337_vm11 = vmor %vm335_vm10, %vm336_vm9 }
 0x596   :  { %v332_v7 = vsub.f32 1.0, %v331_v2 }
 0x598   :  { %v333_v10 = vmul.f32 %v1877_v1, %v332_v7 }
 0x59a   :  { %v334_v12 = vadd.f32 %v1877_v1, %v333_v10 }
 0x59c   :  { %v338_v14 = vsel %vm337_vm11, %v1877_v1, %v334_v12  ;;  %v634_v1 = vld [vmem:[#allocation2 + $0x6] sm:$0x3] }
 0x59d   :  { %v343_v15 = vsel %vm340_vm12, %v342_v13, %v338_v14 }
 0x59e   :  { %v345_v16 = vmul.f32 2.0, %v343_v15  ;;  %v347_v42 = vmul.f32 0.0, %v343_v15 }
 0x5a0   :  { %v1773_v17 = vadd.f32 -1.0, %v345_v16 }
 0x5a2   :  { %349 = vrot.lane.b32.xlu0 %v1773_v17, %s2065_s0 }
 0x5e4   :  { %v419_v18 = vpop.permute.xlu2 %418 }
 0x5e5   :  { %v421_v8 = vmul.f32 %v419_v18, %v412_v60 }
 0x5e7   :  { %423 = vrot.lane.b32.xlu2 %v421_v8, %s2066_s1 }
 0x5f9   :  { %v481_v19 = vpop.permute.xlu1 %480 }
 0x5fa   :  { %v483_v20 = vmul.f32 %v481_v19, %v2265_v46 }
 0x5fc   :  { %485 = vrot.lane.b32.xlu1 %v483_v20, %s2066_s1 }
 0x614   :  { %v350_v21 = vpop.permute.xlu0 %349 }
 0x615   :  { %v352_v23 = vmul.f32 %v350_v21, %v343_v15 }
 0x617   :  { %354 = vrot.lane.b32.xlu0 %v352_v23, %s2066_s1 }
 0x641   :  { %v424_v25 = vpop.permute.xlu2 %423 }
 0x642   :  { %v2276_v26 = vadd.f32 %v424_v25, %v416_v24 }
 0x644   :  { %1878 = vtanh.f32 %v2276_v26 }
 0x64a   :  { %v1879_v27 = vpop.eup %1878 }
 0x64b   :  { %429 = vrot.lane.b32.xlu2 %v1879_v27, %s2065_s0 }
 0x66e   :  { %v486_v29 = vpop.permute.xlu1 %485 }
 0x66f   :  { %v2282_v31 = vadd.f32 %v486_v29, %v478_v28 }
 0x671   :  { %1880 = vtanh.f32 %v2282_v31 }
 0x677   :  { %v1881_v32 = vpop.eup %1880 }
 0x678   :  { %491 = vrot.lane.b32.xlu1 %v1881_v32, %s2065_s0 }
 0x689   :  { %v355_v34 = vpop.permute.xlu0 %354 }
 0x68a   :  { %v2286_v43 = vadd.f32 %v355_v34, %v347_v42 }
 0x68c   :  { %1882 = vtanh.f32 %v2286_v43 }
 0x692   :  { %v1883_v45 = vpop.eup %1882 }
 0x693   :  { %360 = vrot.lane.b32.xlu0 %v1883_v45, %s2065_s0 }
 0x6a5   :  { %v430_v33 = vpop.permute.xlu2 %429 }
 0x6a6   :  { %v432_v48 = vmul.f32 %v430_v33, %v412_v60 }
 0x6a8   :  { %496 = vrot.lane.b32.xlu0 %v432_v48, %s2066_s1  ;;  %569 = vrot.lane.b32.xlu2 %v432_v48, %s2065_s0 }
 0x6ea   :  { %v492_v30 = vpop.permute.xlu1 %491 }
 0x6eb   :  { %v494_v51 = vmul.f32 %v492_v30, %v2265_v46 }
 0x6ed   :  { %566 = vrot.lane.b32.xlu1 %v494_v51, %s2066_s1 }
 0x702   :  { %v570_v61 = vpop.permute.xlu2 %569 }
 0x705   :  { %v361_v57 = vpop.permute.xlu0 %360 }
 0x706   :  { %v363_v59 = vmul.f32 %v361_v57, %v343_v15 }
 0x708   :  { %500 = vrot.lane.b32.xlu1 %v363_v59, %s2065_s0 }
 0x71a   :  { %v497_v46 = vpop.permute.xlu0 %496 }
 0x75f   :  { %v567_v62 = vpop.permute.xlu1 %566 }
 0x760   :  { %v572_v63 = vsel %vm104_vm5, %v567_v62, %v570_v61  ;;  %1786 = vmatmul.msk.f32.vlgmr.msra.gmra.mxu0 %vm104_vm5, %v567_v62 }
 0x761   :  { %1783 = vmatmul.msk.f32.vlgmr.msra.gmra.mxu3 %vm173_vm6, %v572_v63  ;;  %1118 = vmatpush.msra.mxu0 %v2182_v49 }
 0x762   :  { %1252 = vmatpush.msra.mxu3 %v2089_v3 }
 0x763   :  { %1119 = vmatpush.msra.mxu0 %v2184_v50 }
 0x764   :  { %1253 = vmatpush.msra.mxu3 %v2091_v4 }
 0x765   :  { %1120 = vmatpush.msra.mxu0 %v2188_v52 }
 0x766   :  { %1254 = vmatpush.msra.mxu3 %v2094_v5 }
 0x767   :  { %1121 = vmatpush.msra.mxu0 %v2194_v53 }
 0x768   :  { %1255 = vmatpush.msra.mxu3 %v2099_v6 }
 0x769   :  { %1122 = vmatpush.msra.mxu0 %v2199_v54 }
 0x76b   :  { %1123 = vmatpush.msra.mxu0 %v2204_v55 }
 0x76d   :  { %1124 = vmatpush.msra.mxu0 %v2209_v56 }
 0x76f   :  { %1125 = vmatpush.msra.mxu0 %v2218_v58 }
 0x77a   :  { %v501_v60 = vpop.permute.xlu1 %500 }
 0x77b   :  { %v503_v0 = vsel %vm104_vm5, %v497_v46, %v501_v60 }
 0x77c   :  { %1780 = vmatmul.msk.f32.vlgmr.msrb.gmra.mxu2 %vm173_vm6, %v503_v0 }
 0x77d   :  { %1051 = vmatpush.msrb.mxu2 %v2089_v3 }
 0x77f   :  { %1052 = vmatpush.msrb.mxu2 %v2091_v4 }
 0x781   :  { %1053 = vmatpush.msrb.mxu2 %v2094_v5 }
 0x783   :  { %1054 = vmatpush.msrb.mxu2 %v2099_v6 }
 0x7dd   :  { %v654_v2 = vpop.f32.mrf.mxu0 }
 0x7de   :  { %v657_v7 = vadd.f32 %v654_v2, %v634_v1 }
 0x7e0   :  { %v1787_v9 = vmul.f32 -1.442695, %v657_v7 }
 0x7e2   :  { %1884 = vpow2.f32 %v1787_v9 }
 0x7e4   :  { %v593_v10 = vpop.f32.mrf.mxu3 }
 0x7e5   :  { %v594_v11 = vadd.f32 %v2163_v47, %v593_v10 }
 0x7e7   :  { %v1784_v12 = vmul.f32 -1.442695, %v594_v11 }
 0x7e8   :  { %v1885_v13 = vpop.eup %1884 }
 0x7e9   :  { %v661_v14 = vadd.f32 1.0, %v1885_v13  ;;  %1886 = vpow2.f32 %v1784_v12 }
 0x7eb   :  { %1888 = vrcp.f32 %v661_v14  ;;  %v673_v6 = vand.u32 2147483648, %v661_v14  ;;  %v671_v18 = vand.u32 2147483647, %v661_v14  ;;  %vm667_vm14 = vweird.f32 %v661_v14 }
 0x7ed   :  { %v674_v21 = vor.u32 1.1754944e-38, %v673_v6  ;;  %vm672_vm0 = vcmp.eq.f32.partialorder %v671_v18, 8.507059e+37 }
 0x7ef   :  { %v1887_v3 = vpop.eup %1886 }
 0x7f0   :  { %v599_v15 = vadd.f32 1.0, %v1887_v3 }
 0x7f1   :  { %v1889_v4 = vpop.eup %1888 }
 0x7f2   :  { %v663_v16 = vmul.f32 %v1889_v4, %v661_v14  ;;  %1890 = vrcp.f32 %v599_v15  ;;  %vm668_vm13 = vweird.f32 %v1889_v4  ;;  %v611_v28 = vand.u32 2147483648, %v599_v15 }
 0x7f3   :  { %vm669_vm15 = vmor %vm667_vm14, %vm668_vm13  ;;  %v609_v32 = vand.u32 2147483647, %v599_v15  ;;  %vm605_vm2 = vweird.f32 %v599_v15 }
 0x7f4   :  { %v664_v5 = vsub.f32 1.0, %v663_v16  ;;  %v612_v48 = vor.u32 1.1754944e-38, %v611_v28 }
 0x7f5   :  { %vm610_vm4 = vcmp.eq.f32.partialorder %v609_v32, 8.507059e+37 }
 0x7f6   :  { %v665_v17 = vmul.f32 %v1889_v4, %v664_v5 }
 0x7f8   :  { %v1891_v8 = vpop.eup %1890  ;;  %v666_v19 = vadd.f32 %v1889_v4, %v665_v17 }
 0x7f9   :  { %v601_v20 = vmul.f32 %v1891_v8, %v599_v15  ;;  %vm606_vm1 = vweird.f32 %v1891_v8 }
 0x7fa   :  { %v670_v23 = vsel %vm669_vm15, %v1889_v4, %v666_v19  ;;  %vm607_vm3 = vmor %vm605_vm2, %vm606_vm1 }
 0x7fb   :  { %v602_v24 = vsub.f32 1.0, %v601_v20  ;;  %v2317_v25 = vsel %vm672_vm0, %v674_v21, %v670_v23 }
 0x7fc   :  { %v677_v27 = vmul.f32 2.0, %v2317_v25  ;;  %v679_v17 = vmul.f32 %v2317_v25, %v2282_v31 }
 0x7fd   :  { %v603_v29 = vmul.f32 %v1891_v8, %v602_v24 }
 0x7fe   :  { %v1788_v42 = vadd.f32 -1.0, %v677_v27 }
 0x7ff   :  { %v524_v34 = vpop.f32.mrf.mxu2  ;;  %v604_v45 = vadd.f32 %v1891_v8, %v603_v29 }
 0x800   :  { %v525_v33 = vadd.f32 %v2262_v22, %v524_v34  ;;  %681 = vrot.lane.b32.xlu2 %v1788_v42, %s2065_s0 }
 0x801   :  { %v608_v30 = vsel %vm607_vm3, %v1891_v8, %v604_v45 }
 0x802   :  { %v1781_v51 = vmul.f32 -1.442695, %v525_v33  ;;  %v613_v57 = vsel %vm610_vm4, %v612_v48, %v608_v30  ;;  %v835_v48 = vld [vmem:[#allocation2 + $0x8] sm:$0x3] }
 0x803   :  { %v615_v59 = vmul.f32 2.0, %v613_v57  ;;  %v617_v20 = vmul.f32 %v613_v57, %v2276_v26 }
 0x804   :  { %1892 = vpow2.f32 %v1781_v51 }
 0x805   :  { %v1785_v61 = vadd.f32 -1.0, %v615_v59 }
 0x807   :  { %619 = vrot.lane.b32.xlu0 %v1785_v61, %s2065_s0 }
 0x80a   :  { %v1893_v62 = vpop.eup %1892 }
 0x80b   :  { %v530_v63 = vadd.f32 1.0, %v1893_v62 }
 0x80d   :  { %1894 = vrcp.f32 %v530_v63  ;;  %v542_v1 = vand.u32 2147483648, %v530_v63  ;;  %v540_v7 = vand.u32 2147483647, %v530_v63  ;;  %vm536_vm8 = vweird.f32 %v530_v63 }
 0x80f   :  { %v543_v10 = vor.u32 1.1754944e-38, %v542_v1  ;;  %vm541_vm10 = vcmp.eq.f32.partialorder %v540_v7, 8.507059e+37 }
 0x813   :  { %v1895_v46 = vpop.eup %1894 }
 0x814   :  { %v532_v60 = vmul.f32 %v1895_v46, %v530_v63  ;;  %vm537_vm7 = vweird.f32 %v1895_v46 }
 0x815   :  { %vm538_vm9 = vmor %vm536_vm8, %vm537_vm7 }
 0x816   :  { %v533_v0 = vsub.f32 1.0, %v532_v60 }
 0x818   :  { %v534_v2 = vmul.f32 %v1895_v46, %v533_v0 }
 0x81a   :  { %v535_v9 = vadd.f32 %v1895_v46, %v534_v2 }
 0x81c   :  { %v539_v11 = vsel %vm538_vm9, %v1895_v46, %v535_v9 }
 0x81d   :  { %v544_v12 = vsel %vm541_vm10, %v543_v10, %v539_v11 }
 0x81e   :  { %v546_v13 = vmul.f32 2.0, %v544_v12  ;;  %v548_v31 = vmul.f32 %v544_v12, %v2286_v43 }
 0x820   :  { %v1782_v14 = vadd.f32 -1.0, %v546_v13 }
 0x822   :  { %550 = vrot.lane.b32.xlu1 %v1782_v14, %s2065_s0 }
 0x85a   :  { %v682_v3 = vpop.permute.xlu2 %681 }
 0x85b   :  { %v684_v15 = vmul.f32 %v682_v3, %v2317_v25 }
 0x85d   :  { %686 = vrot.lane.b32.xlu2 %v684_v15, %s2066_s1 }
 0x879   :  { %v620_v4 = vpop.permute.xlu0 %619 }
 0x87a   :  { %v622_v16 = vmul.f32 %v620_v4, %v613_v57 }
 0x87c   :  { %624 = vrot.lane.b32.xlu0 %v622_v16, %s2066_s1 }
 0x894   :  { %v551_v5 = vpop.permute.xlu1 %550 }
 0x895   :  { %v553_v6 = vmul.f32 %v551_v5, %v544_v12 }
 0x897   :  { %555 = vrot.lane.b32.xlu1 %v553_v6, %s2066_s1 }
 0x8b7   :  { %v687_v18 = vpop.permute.xlu2 %686 }
 0x8b8   :  { %v2330_v8 = vadd.f32 %v687_v18, %v679_v17 }
 0x8ba   :  { %1896 = vtanh.f32 %v2330_v8 }
 0x8c0   :  { %v1897_v19 = vpop.eup %1896 }
 0x8c1   :  { %692 = vrot.lane.b32.xlu2 %v1897_v19, %s2065_s0 }
 0x8ee   :  { %v625_v21 = vpop.permute.xlu0 %624 }
 0x8ef   :  { %v2335_v23 = vadd.f32 %v625_v21, %v617_v20 }
 0x8f1   :  { %1898 = vtanh.f32 %v2335_v23 }
 0x8f7   :  { %v1899_v24 = vpop.eup %1898 }
 0x8f8   :  { %630 = vrot.lane.b32.xlu0 %v1899_v24, %s2065_s0 }
 0x909   :  { %v556_v27 = vpop.permute.xlu1 %555 }
 0x90a   :  { %v2340_v28 = vadd.f32 %v556_v27, %v548_v31 }
 0x90c   :  { %1900 = vtanh.f32 %v2340_v28 }
 0x912   :  { %v1901_v29 = vpop.eup %1900 }
 0x913   :  { %561 = vrot.lane.b32.xlu1 %v1901_v29, %s2065_s0 }
 0x91b   :  { %v693_v32 = vpop.permute.xlu2 %692 }
 0x91c   :  { %v695_v26 = vmul.f32 %v693_v32, %v2317_v25 }
 0x91e   :  { %767 = vrot.lane.b32.xlu2 %v695_v26, %s2066_s1 }
 0x96a   :  { %v631_v42 = vpop.permute.xlu0 %630 }
 0x96b   :  { %v633_v34 = vmul.f32 %v631_v42, %v613_v57 }
 0x96d   :  { %697 = vrot.lane.b32.xlu1 %v633_v34, %s2066_s1  ;;  %770 = vrot.lane.b32.xlu0 %v633_v34, %s2065_s0 }
 0x978   :  { %v768_v43 = vpop.permute.xlu2 %767 }
 0x979   :  { %1795 = vmatmul.msk.f32.vlgmr.msra.gmra.mxu2 %vm104_vm5, %v768_v43 }
 0x97a   :  { %1187 = vmatpush.msra.mxu2 %v2119_v35 }
 0x97c   :  { %1188 = vmatpush.msra.mxu2 %v2121_v36 }
 0x97e   :  { %1189 = vmatpush.msra.mxu2 %v2125_v37 }
 0x980   :  { %1190 = vmatpush.msra.mxu2 %v2129_v38  ;;  %v1994_v38 = vld [vmem:[#allocation5 + $0x28] sm:$0xff] }
 0x982   :  { %1191 = vmatpush.msra.mxu2 %v2133_v39 }
 0x984   :  { %1192 = vmatpush.msra.mxu2 %v2137_v40  ;;  %v1995_v40 = vld [vmem:[#allocation5 + $0x20] sm:$0xff] }
 0x985   :  { %v562_v25 = vpop.permute.xlu1 %561 }
 0x986   :  { %v564_v45 = vmul.f32 %v562_v25, %v544_v12  ;;  %1193 = vmatpush.msra.mxu2 %v2141_v41  ;;  %v1996_v41 = vld [vmem:[#allocation5 + $0x18] sm:$0xff] }
 0x988   :  { %701 = vrot.lane.b32.xlu2 %v564_v45, %s2065_s0  ;;  %1194 = vmatpush.msra.mxu2 %v2148_v44  ;;  %v1997_v44 = vld [vmem:[#allocation5 + $0x10] sm:$0xff] }
 0x9df   :  { %v771_v33 = vpop.permute.xlu0 %770  ;;  %v698_v36 = vpop.permute.xlu1 %697 }
 0x9e0   :  { %v773_v35 = vsel %vm104_vm5, %v768_v43, %v771_v33 }
 0x9e1   :  { %1792 = vmatmul.msk.f32.vlgmr.msrb.gmra.mxu0 %vm173_vm6, %v773_v35 }
 0x9e2   :  { %v702_v37 = vpop.permute.xlu2 %701  ;;  %1453 = vmatpush.msrb.mxu0 %v1994_v38 }
 0x9e3   :  { %v704_v39 = vsel %vm104_vm5, %v698_v36, %v702_v37 }
 0x9e4   :  { %1789 = vmatmul.msk.f32.vlgmr.msra.gmra.mxu1 %vm173_vm6, %v704_v39  ;;  %1454 = vmatpush.msrb.mxu0 %v1995_v40 }
 0x9e5   :  { %1319 = vmatpush.msra.mxu1 %v2182_v49 }
 0x9e6   :  { %1455 = vmatpush.msrb.mxu0 %v1996_v41 }
 0x9e7   :  { %1320 = vmatpush.msra.mxu1 %v2184_v50 }
 0x9e8   :  { %1456 = vmatpush.msrb.mxu0 %v1997_v44 }
 0x9e9   :  { %1321 = vmatpush.msra.mxu1 %v2188_v52 }
 0x9eb   :  { %1322 = vmatpush.msra.mxu1 %v2194_v53 }
 0x9ed   :  { %1323 = vmatpush.msra.mxu1 %v2199_v54 }
 0x9ef   :  { %1324 = vmatpush.msra.mxu1 %v2204_v55 }
 0x9f1   :  { %1325 = vmatpush.msra.mxu1 %v2209_v56 }
 0x9f3   :  { %1326 = vmatpush.msra.mxu1 %v2218_v58 }
 0x9fc   :  { %v855_v30 = vpop.f32.mrf.mxu2 }
 0x9fd   :  { %v858_v51 = vadd.f32 %v855_v30, %v835_v48 }
 0x9ff   :  { %v1796_v57 = vmul.f32 -1.442695, %v858_v51 }
 0xa01   :  { %1902 = vpow2.f32 %v1796_v57 }
 0xa07   :  { %v1903_v59 = vpop.eup %1902 }
 0xa08   :  { %v862_v61 = vadd.f32 1.0, %v1903_v59 }
 0xa0a   :  { %1904 = vrcp.f32 %v862_v61  ;;  %v874_v60 = vand.u32 2147483648, %v862_v61  ;;  %v872_v1 = vand.u32 2147483647, %v862_v61  ;;  %vm868_vm12 = vweird.f32 %v862_v61 }
 0xa0c   :  { %v875_v7 = vor.u32 1.1754944e-38, %v874_v60  ;;  %vm873_vm14 = vcmp.eq.f32.partialorder %v872_v1, 8.507059e+37 }
 0xa10   :  { %v1905_v62 = vpop.eup %1904 }
 0xa11   :  { %v864_v63 = vmul.f32 %v1905_v62, %v862_v61  ;;  %vm869_vm11 = vweird.f32 %v1905_v62 }
 0xa12   :  { %vm870_vm13 = vmor %vm868_vm12, %vm869_vm11 }
 0xa13   :  { %v865_v46 = vsub.f32 1.0, %v864_v63 }
 0xa15   :  { %v866_v0 = vmul.f32 %v1905_v62, %v865_v46 }
 0xa17   :  { %v867_v2 = vadd.f32 %v1905_v62, %v866_v0 }
 0xa19   :  { %v871_v9 = vsel %vm870_vm13, %v1905_v62, %v867_v2 }
 0xa1a   :  { %v2370_v10 = vsel %vm873_vm14, %v875_v7, %v871_v9 }
 0xa1b   :  { %v878_v11 = vmul.f32 2.0, %v2370_v10  ;;  %v880_v62 = vmul.f32 %v2370_v10, %v2330_v8 }
 0xa1d   :  { %v1797_v12 = vadd.f32 -1.0, %v878_v11 }
 0xa1f   :  { %882 = vrot.lane.b32.xlu0 %v1797_v12, %s2065_s0 }
 0xa5e   :  { %v794_v13 = vpop.f32.mrf.mxu0 }
 0xa5f   :  { %v795_v14 = vadd.f32 %v2163_v47, %v794_v13 }
 0xa61   :  { %v1793_v3 = vmul.f32 -1.442695, %v795_v14  ;;  %v725_v15 = vpop.f32.mrf.mxu1 }
 0xa62   :  { %v726_v4 = vadd.f32 %v2262_v22, %v725_v15 }
 0xa63   :  { %1906 = vpow2.f32 %v1793_v3 }
 0xa64   :  { %v1790_v16 = vmul.f32 -1.442695, %v726_v4 }
 0xa66   :  { %1908 = vpow2.f32 %v1790_v16 }
 0xa69   :  { %v1907_v5 = vpop.eup %1906 }
 0xa6a   :  { %v800_v6 = vadd.f32 1.0, %v1907_v5 }
 0xa6c   :  { %v1909_v17 = vpop.eup %1908  ;;  %1910 = vrcp.f32 %v800_v6  ;;  %v812_v27 = vand.u32 2147483648, %v800_v6  ;;  %v810_v29 = vand.u32 2147483647, %v800_v6  ;;  %vm806_vm0 = vweird.f32 %v800_v6 }
 0xa6d   :  { %v731_v18 = vadd.f32 1.0, %v1909_v17  ;;  %v2417_v17 = vld [vmem:[#allocation5 + $0x60] sm:$0xff] }
 0xa6e   :  { %v813_v34 = vor.u32 1.1754944e-38, %v812_v27  ;;  %vm811_vm3 = vcmp.eq.f32.partialorder %v810_v29, 8.507059e+37  ;;  %v1036_v29 = vld [vmem:[#allocation2 + $0xa] sm:$0x3] }
 0xa6f   :  { %1912 = vrcp.f32 %v731_v18  ;;  %v743_v42 = vand.u32 2147483648, %v731_v18  ;;  %v741_v25 = vand.u32 2147483647, %v731_v18  ;;  %vm737_vm4 = vweird.f32 %v731_v18 }
 0xa71   :  { %v744_v37 = vor.u32 1.1754944e-38, %v743_v42  ;;  %vm742_vm8 = vcmp.eq.f32.partialorder %v741_v25, 8.507059e+37 }
 0xa72   :  { %v1911_v19 = vpop.eup %1910 }
 0xa73   :  { %v802_v20 = vmul.f32 %v1911_v19, %v800_v6  ;;  %vm807_vm15 = vweird.f32 %v1911_v19  ;;  %v2414_v6 = vld [vmem:[#allocation5 + $0x68] sm:$0xff] }
 0xa74   :  { %vm808_vm1 = vmor %vm806_vm0, %vm807_vm15 }
 0xa75   :  { %v1913_v21 = vpop.eup %1912  ;;  %v803_v24 = vsub.f32 1.0, %v802_v20  ;;  %v2426_v20 = vld [vmem:[#allocation5 + $0x48] sm:$0xff] }
 0xa76   :  { %v733_v31 = vmul.f32 %v1913_v21, %v731_v18  ;;  %vm738_vm2 = vweird.f32 %v1913_v21  ;;  %v2420_v18 = vld [vmem:[#allocation5 + $0x58] sm:$0xff] }
 0xa77   :  { %v804_v47 = vmul.f32 %v1911_v19, %v803_v24  ;;  %vm739_vm7 = vmor %vm737_vm4, %vm738_vm2  ;;  %v2432_v24 = vld [vmem:[#allocation5 + $0x38] sm:$0xff] }
 0xa78   :  { %v734_v32 = vsub.f32 1.0, %v733_v31  ;;  %v2435_v31 = vld [vmem:[#allocation5 + $0x30] sm:$0xff] }
 0xa79   :  { %v805_v26 = vadd.f32 %v1911_v19, %v804_v47 }
 0xa7a   :  { %v735_v43 = vmul.f32 %v1913_v21, %v734_v32 }
 0xa7b   :  { %v809_v45 = vsel %vm808_vm1, %v1911_v19, %v805_v26  ;;  %v2423_v19 = vld [vmem:[#allocation5 + $0x50] sm:$0xff] }
 0xa7c   :  { %v814_v33 = vsel %vm811_vm3, %v813_v34, %v809_v45  ;;  %v736_v35 = vadd.f32 %v1913_v21, %v735_v43 }
 0xa7d   :  { %v816_v36 = vmul.f32 2.0, %v814_v33  ;;  %v818_v8 = vmul.f32 %v814_v33, %v2335_v23 }
 0xa7e   :  { %v740_v38 = vsel %vm739_vm7, %v1913_v21, %v736_v35  ;;  %v2429_v21 = vld [vmem:[#allocation5 + $0x40] sm:$0xff] }
 0xa7f   :  { %v1794_v39 = vadd.f32 -1.0, %v816_v36  ;;  %v745_v40 = vsel %vm742_vm8, %v744_v37, %v740_v38 }
 0xa80   :  { %v747_v41 = vmul.f32 2.0, %v745_v40  ;;  %v749_v0 = vmul.f32 %v745_v40, %v2340_v28 }
 0xa81   :  { %820 = vrot.lane.b32.xlu1 %v1794_v39, %s2065_s0 }
 0xa82   :  { %v1791_v44 = vadd.f32 -1.0, %v747_v41 }
 0xa84   :  { %751 = vrot.lane.b32.xlu2 %v1791_v44, %s2065_s0  ;;  %v2453_v44 = vld [vmem:[#allocation5 + $0xb8] ss:$0 sm:$0xff] }
 0xa91   :  { %v883_v48 = vpop.permute.xlu0 %882 }
 0xa92   :  { %v885_v30 = vmul.f32 %v883_v48, %v2370_v10 }
 0xa94   :  { %887 = vrot.lane.b32.xlu0 %v885_v30, %s2066_s1 }
 0xade   :  { %v752_v51 = vpop.permute.xlu2 %751 }
 0xadf   :  { %v754_v57 = vmul.f32 %v752_v51, %v745_v40 }
 0xae1   :  { %756 = vrot.lane.b32.xlu2 %v754_v57, %s2066_s1 }
 0xaf3   :  { %v821_v59 = vpop.permute.xlu1 %820 }
 0xaf4   :  { %v823_v61 = vmul.f32 %v821_v59, %v814_v33 }
 0xaf6   :  { %825 = vrot.lane.b32.xlu1 %v823_v61, %s2066_s1 }
 0xb06   :  { %v888_v63 = vpop.permute.xlu0 %887 }
 0xb07   :  { %v2384_v46 = vadd.f32 %v888_v63, %v880_v62 }
 0xb09   :  { %1914 = vtanh.f32 %v2384_v46 }
 0xb0f   :  { %v1915_v60 = vpop.eup %1914 }
 0xb10   :  { %893 = vrot.lane.b32.xlu0 %v1915_v60, %s2065_s0 }
 0xb3b   :  { %v757_v1 = vpop.permute.xlu2 %756 }
 0xb3c   :  { %v2389_v2 = vadd.f32 %v757_v1, %v749_v0 }
 0xb3e   :  { %1916 = vtanh.f32 %v2389_v2 }
 0xb44   :  { %v1917_v7 = vpop.eup %1916 }
 0xb45   :  { %762 = vrot.lane.b32.xlu2 %v1917_v7, %s2065_s0 }
 0xb68   :  { %v826_v9 = vpop.permute.xlu1 %825 }
 0xb69   :  { %v2394_v11 = vadd.f32 %v826_v9, %v818_v8 }
 0xb6b   :  { %1918 = vtanh.f32 %v2394_v11 }
 0xb71   :  { %v1919_v12 = vpop.eup %1918 }
 0xb72   :  { %831 = vrot.lane.b32.xlu1 %v1919_v12, %s2065_s0 }
 0xb82   :  { %v894_v13 = vpop.permute.xlu0 %893 }
 0xb83   :  { %v896_v28 = vmul.f32 %v894_v13, %v2370_v10 }
 0xb85   :  { %968 = vrot.lane.b32.xlu0 %v896_v28, %s2066_s1 }
 0xb9f   :  { %v763_v14 = vpop.permute.xlu2 %762 }
 0xba0   :  { %v765_v3 = vmul.f32 %v763_v14, %v745_v40 }
 0xba2   :  { %902 = vrot.lane.b32.xlu0 %v765_v3, %s2065_s0 }
 0xbe4   :  { %v832_v15 = vpop.permute.xlu1 %831 }
 0xbe5   :  { %v834_v4 = vmul.f32 %v832_v15, %v814_v33 }
 0xbe7   :  { %971 = vrot.lane.b32.xlu1 %v834_v4, %s2065_s0  ;;  %898 = vrot.lane.b32.xlu2 %v834_v4, %s2066_s1 }
 0xbf7   :  { %v969_v23 = vpop.permute.xlu0 %968 }
 0xbf8   :  { %1804 = vmatmul.msk.f32.vlgmr.msrb.gmra.mxu2 %vm104_vm5, %v969_v23 }
 0xbf9   :  { %1520 = vmatpush.msrb.mxu2 %v2182_v49 }
 0xbfb   :  { %1521 = vmatpush.msrb.mxu2 %v2184_v50 }
 0xbfd   :  { %1522 = vmatpush.msrb.mxu2 %v2188_v52 }
 0xbff   :  { %1523 = vmatpush.msrb.mxu2 %v2194_v53 }
 0xc01   :  { %1524 = vmatpush.msrb.mxu2 %v2199_v54 }
 0xc03   :  { %1525 = vmatpush.msrb.mxu2 %v2204_v55 }
 0xc05   :  { %1526 = vmatpush.msrb.mxu2 %v2209_v56 }
 0xc07   :  { %1527 = vmatpush.msrb.mxu2 %v2218_v58 }
 0xc14   :  { %v903_v10 = vpop.permute.xlu0 %902 }
 0xc41   :  { %v899_v16 = vpop.permute.xlu2 %898 }
 0xc42   :  { %v905_v5 = vsel %vm104_vm5, %v899_v16, %v903_v10 }
 0xc43   :  { %1798 = vmatmul.msk.f32.vlgmr.msrb.gmra.mxu3 %vm173_vm6, %v905_v5 }
 0xc44   :  { %1388 = vmatpush.msrb.mxu3 %v2414_v6 }
 0xc46   :  { %1389 = vmatpush.msrb.mxu3 %v2417_v17 }
 0xc48   :  { %1390 = vmatpush.msrb.mxu3 %v2420_v18 }
 0xc4a   :  { %1391 = vmatpush.msrb.mxu3 %v2423_v19 }
 0xc4c   :  { %1392 = vmatpush.msrb.mxu3 %v2426_v20 }
 0xc4e   :  { %1393 = vmatpush.msrb.mxu3 %v2429_v21 }
 0xc50   :  { %1394 = vmatpush.msrb.mxu3 %v2432_v24 }
 0xc52   :  { %1395 = vmatpush.msrb.mxu3 %v2435_v31 }
 0xc59   :  { %v972_v27 = vpop.permute.xlu1 %971 }
 0xc5a   :  { %v974_v47 = vsel %vm104_vm5, %v969_v23, %v972_v27 }
 0xc5b   :  { %1801 = vmatmul.msk.f32.vlgmr.msrb.gmra.mxu1 %vm173_vm6, %v974_v47 }
 0xc5c   :  { %1659 = vmatpush.msrb.mxu1 %v2182_v49 }
 0xc5e   :  { %1660 = vmatpush.msrb.mxu1 %v2184_v50 }
 0xc60   :  { %1661 = vmatpush.msrb.mxu1 %v2188_v52 }
 0xc62   :  { %1662 = vmatpush.msrb.mxu1 %v2194_v53 }
 0xc64   :  { %1663 = vmatpush.msrb.mxu1 %v2199_v54 }
 0xc66   :  { %1664 = vmatpush.msrb.mxu1 %v2204_v55 }
 0xc68   :  { %1665 = vmatpush.msrb.mxu1 %v2209_v56 }
 0xc6a   :  { %1666 = vmatpush.msrb.mxu1 %v2218_v58 }
 0xc7b   :  { %v1056_v32 = vpop.f32.mrf.mxu2 }
 0xc7c   :  { %v1059_v26 = vadd.f32 %v1056_v32, %v1036_v29 }
 0xc7e   :  { %v1805_v42 = vmul.f32 -1.442695, %v1059_v26 }
 0xc80   :  { %1920 = vpow2.f32 %v1805_v42 }
 0xc86   :  { %v1921_v49 = vpop.eup %1920 }
 0xc87   :  { %v1063_v34 = vadd.f32 1.0, %v1921_v49 }
 0xc89   :  { %1922 = vrcp.f32 %v1063_v34  ;;  %v1075_v53 = vand.u32 2147483648, %v1063_v34  ;;  %v1073_v54 = vand.u32 2147483647, %v1063_v34  ;;  %vm1069_vm10 = vweird.f32 %v1063_v34 }
 0xc8b   :  { %v1076_v56 = vor.u32 1.1754944e-38, %v1075_v53  ;;  %vm1074_vm12 = vcmp.eq.f32.partialorder %v1073_v54, 8.507059e+37 }
 0xc8f   :  { %v1923_v50 = vpop.eup %1922 }
 0xc90   :  { %v1065_v52 = vmul.f32 %v1923_v50, %v1063_v34  ;;  %vm1070_vm9 = vweird.f32 %v1923_v50 }
 0xc91   :  { %vm1071_vm11 = vmor %vm1069_vm10, %vm1070_vm9 }
 0xc92   :  { %v1066_v43 = vsub.f32 1.0, %v1065_v52 }
 0xc94   :  { %v1067_v25 = vmul.f32 %v1923_v50, %v1066_v43 }
 0xc96   :  { %v1068_v55 = vadd.f32 %v1923_v50, %v1067_v25 }
 0xc98   :  { %v1072_v58 = vsel %vm1071_vm11, %v1923_v50, %v1068_v55 }
 0xc99   :  { %v2448_v45 = vsel %vm1074_vm12, %v1076_v56, %v1072_v58 }
 0xc9a   :  { %v1079_v33 = vmul.f32 2.0, %v2448_v45  ;;  %v1081_v26 = vmul.f32 %v2448_v45, %v2384_v46 }
 0xc9c   :  { %v1806_v35 = vadd.f32 -1.0, %v1079_v33 }
 0xc9e   :  { %1083 = vrot.lane.b32.xlu2 %v1806_v35, %s2065_s0 }
 0xcc6   :  { %v926_v36 = vpop.f32.mrf.mxu3 }
 0xcc7   :  { %v927_v37 = vadd.f32 %v2262_v22, %v926_v36 }
 0xcc9   :  { %v1799_v38 = vmul.f32 -1.442695, %v927_v37 }
 0xccb   :  { %1924 = vpow2.f32 %v1799_v38 }
 0xcd1   :  { %v1925_v39 = vpop.eup %1924 }
 0xcd2   :  { %v932_v40 = vadd.f32 1.0, %v1925_v39 }
 0xcd4   :  { %1926 = vrcp.f32 %v932_v40  ;;  %v944_v61 = vand.u32 2147483648, %v932_v40  ;;  %v942_v63 = vand.u32 2147483647, %v932_v40  ;;  %vm938_vm14 = vweird.f32 %v932_v40 }
 0xcd6   :  { %v945_v60 = vor.u32 1.1754944e-38, %v944_v61  ;;  %vm943_vm0 = vcmp.eq.f32.partialorder %v942_v63, 8.507059e+37 }
 0xcd8   :  { %v995_v41 = vpop.f32.mrf.mxu1 }
 0xcd9   :  { %v996_v48 = vadd.f32 %v2453_v44, %v995_v41 }
 0xcda   :  { %v1927_v30 = vpop.eup %1926 }
 0xcdb   :  { %v934_v51 = vmul.f32 %v1927_v30, %v932_v40  ;;  %v1802_v57 = vmul.f32 -1.442695, %v996_v48  ;;  %vm939_vm13 = vweird.f32 %v1927_v30 }
 0xcdc   :  { %vm940_vm15 = vmor %vm938_vm14, %vm939_vm13 }
 0xcdd   :  { %v935_v59 = vsub.f32 1.0, %v934_v51  ;;  %1928 = vpow2.f32 %v1802_v57  ;;  %v1237_v57 = vld [vmem:[#allocation2 + $0xc] sm:$0x3] }
 0xcdf   :  { %v936_v62 = vmul.f32 %v1927_v30, %v935_v59 }
 0xce1   :  { %v937_v22 = vadd.f32 %v1927_v30, %v936_v62 }
 0xce3   :  { %v1929_v0 = vpop.eup %1928  ;;  %v941_v1 = vsel %vm940_vm15, %v1927_v30, %v937_v22 }
 0xce4   :  { %v1001_v7 = vadd.f32 1.0, %v1929_v0  ;;  %v946_v8 = vsel %vm943_vm0, %v945_v60, %v941_v1 }
 0xce5   :  { %v948_v9 = vmul.f32 2.0, %v946_v8  ;;  %v950_v25 = vmul.f32 %v946_v8, %v2389_v2 }
 0xce6   :  { %1930 = vrcp.f32 %v1001_v7  ;;  %v1013_v3 = vand.u32 2147483648, %v1001_v7  ;;  %v1011_v4 = vand.u32 2147483647, %v1001_v7  ;;  %vm1007_vm2 = vweird.f32 %v1001_v7 }
 0xce7   :  { %v1800_v12 = vadd.f32 -1.0, %v948_v9 }
 0xce8   :  { %v1014_v10 = vor.u32 1.1754944e-38, %v1013_v3  ;;  %vm1012_vm4 = vcmp.eq.f32.partialorder %v1011_v4, 8.507059e+37  ;;  %v2501_v3 = vld [vmem:[#allocation5 + $0xc0] ss:$0 sm:$0xff] }
 0xce9   :  { %952 = vrot.lane.b32.xlu0 %v1800_v12, %s2065_s0 }
 0xcec   :  { %v1931_v13 = vpop.eup %1930 }
 0xced   :  { %v1003_v28 = vmul.f32 %v1931_v13, %v1001_v7  ;;  %vm1008_vm1 = vweird.f32 %v1931_v13 }
 0xcee   :  { %vm1009_vm3 = vmor %vm1007_vm2, %vm1008_vm1 }
 0xcef   :  { %v1004_v14 = vsub.f32 1.0, %v1003_v28 }
 0xcf1   :  { %v1005_v15 = vmul.f32 %v1931_v13, %v1004_v14 }
 0xcf3   :  { %v1006_v23 = vadd.f32 %v1931_v13, %v1005_v15 }
 0xcf5   :  { %v1010_v16 = vsel %vm1009_vm3, %v1931_v13, %v1006_v23 }
 0xcf6   :  { %v1015_v5 = vsel %vm1012_vm4, %v1014_v10, %v1010_v16 }
 0xcf7   :  { %v1017_v27 = vmul.f32 2.0, %v1015_v5  ;;  %v1019_v56 = vmul.f32 %v1015_v5, %v2394_v11 }
 0xcf8   :  { %v1084_v47 = vpop.permute.xlu2 %1083 }
 0xcf9   :  { %v1086_v29 = vmul.f32 %v1084_v47, %v2448_v45  ;;  %v1803_v32 = vadd.f32 -1.0, %v1017_v27 }
 0xcfb   :  { %1021 = vrot.lane.b32.xlu1 %v1803_v32, %s2065_s0  ;;  %1088 = vrot.lane.b32.xlu2 %v1086_v29, %s2066_s1 }
 0xd55   :  { %v1089_v42 = vpop.permute.xlu2 %1088 }
 0xd56   :  { %v2462_v49 = vadd.f32 %v1089_v42, %v1081_v26 }
 0xd58   :  { %1932 = vtanh.f32 %v2462_v49 }
 0xd5b   :  { %v953_v34 = vpop.permute.xlu0 %952 }
 0xd5c   :  { %v955_v50 = vmul.f32 %v953_v34, %v946_v8 }
 0xd5e   :  { %v1933_v52 = vpop.eup %1932  ;;  %957 = vrot.lane.b32.xlu0 %v955_v50, %s2066_s1 }
 0xd5f   :  { %1094 = vrot.lane.b32.xlu2 %v1933_v52, %s2065_s0 }
 0xd6d   :  { %v1022_v43 = vpop.permute.xlu1 %1021 }
 0xd6e   :  { %v1024_v53 = vmul.f32 %v1022_v43, %v1015_v5 }
 0xd70   :  { %1026 = vrot.lane.b32.xlu1 %v1024_v53, %s2066_s1 }
 0xdb9   :  { %v1095_v36 = vpop.permute.xlu2 %1094 }
 0xdba   :  { %v1097_v2 = vmul.f32 %v1095_v36, %v2448_v45 }
 0xdd0   :  { %v958_v54 = vpop.permute.xlu0 %957 }
 0xdd1   :  { %v2469_v46 = vadd.f32 %v958_v54, %v950_v25 }
 0xdd3   :  { %1934 = vtanh.f32 %v2469_v46 }
 0xdd9   :  { %v1935_v55 = vpop.eup %1934 }
 0xdda   :  { %963 = vrot.lane.b32.xlu0 %v1935_v55, %s2065_s0 }
 0xde2   :  { %v1027_v58 = vpop.permute.xlu1 %1026 }
 0xde3   :  { %v2474_v33 = vadd.f32 %v1027_v58, %v1019_v56 }
 0xde5   :  { %1936 = vtanh.f32 %v2474_v33 }
 0xdeb   :  { %v1937_v35 = vpop.eup %1936 }
 0xdec   :  { %1032 = vrot.lane.b32.xlu1 %v1937_v35, %s2065_s0 }
 0xdf4   :  { %1169 = vrot.lane.b32.xlu1 %v1097_v2, %s2066_s1 }
 0xe4c   :  { %v964_v37 = vpop.permute.xlu0 %963 }
 0xe4d   :  { %v966_v38 = vmul.f32 %v964_v37, %v946_v8 }
 0xe4f   :  { %1103 = vrot.lane.b32.xlu1 %v966_v38, %s2065_s0 }
 0xe5e   :  { %v1033_v39 = vpop.permute.xlu1 %1032 }
 0xe5f   :  { %v1035_v40 = vmul.f32 %v1033_v39, %v1015_v5 }
 0xe61   :  { %1099 = vrot.lane.b32.xlu0 %v1035_v40, %s2066_s1  ;;  %1172 = vrot.lane.b32.xlu2 %v1035_v40, %s2065_s0 }
 0xe66   :  { %v1170_v11 = vpop.permute.xlu1 %1169 }
 0xe67   :  { %1813 = vmatmul.msk.f32.vlgmr.msra.gmra.mxu3 %vm104_vm5, %v1170_v11 }
 0xebb   :  { %v1173_v41 = vpop.permute.xlu2 %1172 }
 0xebc   :  { %v1175_v48 = vsel %vm104_vm5, %v1170_v11, %v1173_v41 }
 0xebd   :  { %1810 = vmatmul.msk.f32.vlgmr.msra.gmra.mxu2 %vm173_vm6, %v1175_v48 }
 0xec1   :  { %v1104_v45 = vpop.permute.xlu1 %1103 }
 0xed3   :  { %v1100_v30 = vpop.permute.xlu0 %1099 }
 0xed4   :  { %v1106_v51 = vsel %vm104_vm5, %v1100_v30, %v1104_v45 }
 0xed5   :  { %1807 = vmatmul.msk.f32.vlgmr.msra.gmra.mxu0 %vm173_vm6, %v1106_v51 }
 0xed6   :  { %1589 = vmatpush.msra.mxu0 %v2414_v6 }
 0xed8   :  { %1590 = vmatpush.msra.mxu0 %v2417_v17 }
 0xeda   :  { %1591 = vmatpush.msra.mxu0 %v2420_v18 }
 0xedc   :  { %1592 = vmatpush.msra.mxu0 %v2423_v19 }
 0xede   :  { %1593 = vmatpush.msra.mxu0 %v2426_v20 }
 0xee0   :  { %1594 = vmatpush.msra.mxu0 %v2429_v21 }
 0xee2   :  { %1595 = vmatpush.msra.mxu0 %v2432_v24 }
 0xee4   :  { %1596 = vmatpush.msra.mxu0 %v2435_v31 }
 0xeea   :  { %v1257_v59 = vpop.f32.mrf.mxu3 }
 0xeeb   :  { %v1260_v61 = vadd.f32 %v1257_v59, %v1237_v57 }
 0xeed   :  { %v1814_v62 = vmul.f32 -1.442695, %v1260_v61 }
 0xeef   :  { %1938 = vpow2.f32 %v1814_v62 }
 0xef5   :  { %v1939_v6 = vpop.eup %1938 }
 0xef6   :  { %v1264_v63 = vadd.f32 1.0, %v1939_v6 }
 0xef8   :  { %1940 = vrcp.f32 %v1264_v63  ;;  %v1276_v19 = vand.u32 2147483648, %v1264_v63  ;;  %v1274_v20 = vand.u32 2147483647, %v1264_v63  ;;  %vm1270_vm8 = vweird.f32 %v1264_v63 }
 0xefa   :  { %v1277_v24 = vor.u32 1.1754944e-38, %v1276_v19  ;;  %vm1275_vm10 = vcmp.eq.f32.partialorder %v1274_v20, 8.507059e+37 }
 0xefe   :  { %v1941_v17 = vpop.eup %1940 }
 0xeff   :  { %v1266_v18 = vmul.f32 %v1941_v17, %v1264_v63  ;;  %vm1271_vm7 = vweird.f32 %v1941_v17 }
 0xf00   :  { %vm1272_vm9 = vmor %vm1270_vm8, %vm1271_vm7 }
 0xf01   :  { %v1267_v22 = vsub.f32 1.0, %v1266_v18 }
 0xf03   :  { %v1268_v60 = vmul.f32 %v1941_v17, %v1267_v22 }
 0xf05   :  { %v1269_v21 = vadd.f32 %v1941_v17, %v1268_v60 }
 0xf07   :  { %v1273_v31 = vsel %vm1272_vm9, %v1941_v17, %v1269_v21 }
 0xf08   :  { %v2496_v0 = vsel %vm1275_vm10, %v1277_v24, %v1273_v31 }
 0xf09   :  { %v1280_v1 = vmul.f32 2.0, %v2496_v0  ;;  %v1282_v51 = vmul.f32 %v2496_v0, %v2462_v49 }
 0xf0b   :  { %v1815_v7 = vadd.f32 -1.0, %v1280_v1 }
 0xf0d   :  { %1284 = vrot.lane.b32.xlu0 %v1815_v7, %s2065_s0 }
 0xf40   :  { %v1196_v8 = vpop.f32.mrf.mxu2 }
 0xf41   :  { %v1197_v9 = vadd.f32 %v2453_v44, %v1196_v8 }
 0xf43   :  { %v1811_v12 = vmul.f32 -1.442695, %v1197_v9 }
 0xf45   :  { %1942 = vpow2.f32 %v1811_v12  ;;  %v1438_v12 = vld [vmem:[#allocation2 + $0xe] sm:$0x3] }
 0xf4b   :  { %v1943_v13 = vpop.eup %1942 }
 0xf4c   :  { %v1202_v28 = vadd.f32 1.0, %v1943_v13 }
 0xf4e   :  { %1944 = vrcp.f32 %v1202_v28  ;;  %v1214_v5 = vand.u32 2147483648, %v1202_v28  ;;  %v1212_v47 = vand.u32 2147483647, %v1202_v28  ;;  %vm1208_vm12 = vweird.f32 %v1202_v28 }
 0xf50   :  { %v1215_v32 = vor.u32 1.1754944e-38, %v1214_v5  ;;  %vm1213_vm14 = vcmp.eq.f32.partialorder %v1212_v47, 8.507059e+37 }
 0xf52   :  { %v1127_v14 = vpop.f32.mrf.mxu0 }
 0xf53   :  { %v1128_v15 = vadd.f32 %v2501_v3, %v1127_v14 }
 0xf54   :  { %v1945_v4 = vpop.eup %1944 }
 0xf55   :  { %v1204_v23 = vmul.f32 %v1945_v4, %v1202_v28  ;;  %v1808_v10 = vmul.f32 -1.442695, %v1128_v15  ;;  %vm1209_vm11 = vweird.f32 %v1945_v4 }
 0xf56   :  { %vm1210_vm13 = vmor %vm1208_vm12, %vm1209_vm11 }
 0xf57   :  { %v1205_v16 = vsub.f32 1.0, %v1204_v23  ;;  %1946 = vpow2.f32 %v1808_v10 }
 0xf59   :  { %v1206_v27 = vmul.f32 %v1945_v4, %v1205_v16 }
 0xf5b   :  { %v1207_v29 = vadd.f32 %v1945_v4, %v1206_v27 }
 0xf5d   :  { %v1947_v26 = vpop.eup %1946  ;;  %v1211_v42 = vsel %vm1210_vm13, %v1945_v4, %v1207_v29 }
 0xf5e   :  { %v1133_v34 = vadd.f32 1.0, %v1947_v26  ;;  %v1216_v50 = vsel %vm1213_vm14, %v1215_v32, %v1211_v42 }
 0xf5f   :  { %v1218_v52 = vmul.f32 2.0, %v1216_v50  ;;  %v1220_v62 = vmul.f32 %v1216_v50, %v2474_v33 }
 0xf60   :  { %1948 = vrcp.f32 %v1133_v34  ;;  %v1145_v55 = vand.u32 2147483648, %v1133_v34  ;;  %v1143_v58 = vand.u32 2147483647, %v1133_v34  ;;  %vm1139_vm0 = vweird.f32 %v1133_v34 }
 0xf61   :  { %v1812_v43 = vadd.f32 -1.0, %v1218_v52 }
 0xf62   :  { %v1146_v36 = vor.u32 1.1754944e-38, %v1145_v55  ;;  %vm1144_vm2 = vcmp.eq.f32.partialorder %v1143_v58, 8.507059e+37 }
 0xf63   :  { %1222 = vrot.lane.b32.xlu2 %v1812_v43, %s2065_s0 }
 0xf66   :  { %v1949_v53 = vpop.eup %1948 }
 0xf67   :  { %v1135_v25 = vmul.f32 %v1949_v53, %v1133_v34  ;;  %vm1140_vm15 = vweird.f32 %v1949_v53 }
 0xf68   :  { %vm1141_vm1 = vmor %vm1139_vm0, %vm1140_vm15 }
 0xf69   :  { %v1136_v54 = vsub.f32 1.0, %v1135_v25 }
 0xf6b   :  { %v1137_v56 = vmul.f32 %v1949_v53, %v1136_v54 }
 0xf6d   :  { %v1138_v35 = vadd.f32 %v1949_v53, %v1137_v56 }
 0xf6f   :  { %v1142_v2 = vsel %vm1141_vm1, %v1949_v53, %v1138_v35 }
 0xf70   :  { %v1147_v37 = vsel %vm1144_vm2, %v1146_v36, %v1142_v2 }
 0xf71   :  { %v1149_v38 = vmul.f32 2.0, %v1147_v37  ;;  %v1151_v49 = vmul.f32 %v1147_v37, %v2469_v46 }
 0xf73   :  { %v1809_v39 = vadd.f32 -1.0, %v1149_v38 }
 0xf75   :  { %1153 = vrot.lane.b32.xlu1 %v1809_v39, %s2065_s0 }
 0xf7f   :  { %v1285_v40 = vpop.permute.xlu0 %1284 }
 0xf80   :  { %v1287_v11 = vmul.f32 %v1285_v40, %v2496_v0 }
 0xf82   :  { %1289 = vrot.lane.b32.xlu0 %v1287_v11, %s2066_s1 }
 0xfbd   :  { %v1223_v41 = vpop.permute.xlu2 %1222 }
 0xfbe   :  { %v1225_v48 = vmul.f32 %v1223_v41, %v1216_v50 }
 0xfc0   :  { %1227 = vrot.lane.b32.xlu2 %v1225_v48, %s2066_s1 }
 0xfe7   :  { %v1154_v45 = vpop.permute.xlu1 %1153 }
 0xfe8   :  { %v1156_v30 = vmul.f32 %v1154_v45, %v1147_v37 }
 0xfea   :  { %1158 = vrot.lane.b32.xlu1 %v1156_v30, %s2066_s1 }
 0xff4   :  { %v1290_v57 = vpop.permute.xlu0 %1289 }
 0xff5   :  { %v2512_v59 = vadd.f32 %v1290_v57, %v1282_v51 }
 0xff7   :  { %1950 = vtanh.f32 %v2512_v59 }
 0xffd   :  { %v1951_v61 = vpop.eup %1950 }
 0xffe   :  { %1295 = vrot.lane.b32.xlu0 %v1951_v61, %s2065_s0 }
0x101a   :  { %v1228_v6 = vpop.permute.xlu2 %1227 }
0x101b   :  { %v2517_v63 = vadd.f32 %v1228_v6, %v1220_v62 }
0x101d   :  { %1952 = vtanh.f32 %v2517_v63 }
0x1023   :  { %v1953_v17 = vpop.eup %1952 }
0x1024   :  { %1233 = vrot.lane.b32.xlu2 %v1953_v17, %s2065_s0 }
0x105c   :  { %v1159_v18 = vpop.permute.xlu1 %1158 }
0x105d   :  { %v2522_v22 = vadd.f32 %v1159_v18, %v1151_v49 }
0x105f   :  { %1954 = vtanh.f32 %v2522_v22 }
0x1065   :  { %v1955_v19 = vpop.eup %1954 }
0x1066   :  { %1164 = vrot.lane.b32.xlu1 %v1955_v19, %s2065_s0 }
0x1070   :  { %v1296_v60 = vpop.permute.xlu0 %1295 }
0x1071   :  { %v1298_v33 = vmul.f32 %v1296_v60, %v2496_v0 }
0x1073   :  { %1370 = vrot.lane.b32.xlu2 %v1298_v33, %s2066_s1 }
0x107e   :  { %v1234_v20 = vpop.permute.xlu2 %1233 }
0x107f   :  { %v1236_v21 = vmul.f32 %v1234_v20, %v1216_v50 }
0x1081   :  { %1300 = vrot.lane.b32.xlu1 %v1236_v21, %s2066_s1  ;;  %1373 = vrot.lane.b32.xlu0 %v1236_v21, %s2065_s0 }
0x10cd   :  { %v1371_v46 = vpop.permute.xlu2 %1370 }
0x10ce   :  { %1822 = vmatmul.msk.f32.vlgmr.msrb.gmra.mxu0 %vm104_vm5, %v1371_v46 }
0x10d8   :  { %v1165_v24 = vpop.permute.xlu1 %1164 }
0x10d9   :  { %v1167_v31 = vmul.f32 %v1165_v24, %v1147_v37 }
0x10db   :  { %1304 = vrot.lane.b32.xlu2 %v1167_v31, %s2065_s0 }
0x10f3   :  { %v1374_v1 = vpop.permute.xlu0 %1373  ;;  %v1301_v0 = vpop.permute.xlu1 %1300 }
0x10f4   :  { %v1376_v7 = vsel %vm104_vm5, %v1371_v46, %v1374_v1 }
0x10f5   :  { %1819 = vmatmul.msk.f32.vlgmr.msrb.gmra.mxu3 %vm173_vm6, %v1376_v7 }
0x1135   :  { %v1305_v8 = vpop.permute.xlu2 %1304 }
0x1136   :  { %v1307_v9 = vsel %vm104_vm5, %v1301_v0, %v1305_v8 }
0x1137   :  { %1816 = vmatmul.msk.f32.vlgmr.msra.gmra.mxu1 %vm173_vm6, %v1307_v9 }
0x114b   :  { %v1458_v13 = vpop.f32.mrf.mxu0 }
0x114c   :  { %v1461_v28 = vadd.f32 %v1458_v13, %v1438_v12 }
0x114e   :  { %v1823_v14 = vmul.f32 -1.442695, %v1461_v28 }
0x1150   :  { %1956 = vpow2.f32 %v1823_v14 }
0x1156   :  { %v1957_v15 = vpop.eup %1956 }
0x1157   :  { %v1465_v4 = vadd.f32 1.0, %v1957_v15 }
0x1159   :  { %1958 = vrcp.f32 %v1465_v4  ;;  %v1477_v5 = vand.u32 2147483648, %v1465_v4  ;;  %v1475_v47 = vand.u32 2147483647, %v1465_v4  ;;  %vm1471_vm4 = vweird.f32 %v1465_v4 }
0x115b   :  { %v1478_v32 = vor.u32 1.1754944e-38, %v1477_v5  ;;  %vm1476_vm8 = vcmp.eq.f32.partialorder %v1475_v47, 8.507059e+37 }
0x115f   :  { %v1959_v23 = vpop.eup %1958 }
0x1160   :  { %v1467_v10 = vmul.f32 %v1959_v23, %v1465_v4  ;;  %vm1472_vm3 = vweird.f32 %v1959_v23 }
0x1161   :  { %vm1473_vm7 = vmor %vm1471_vm4, %vm1472_vm3 }
0x1162   :  { %v1468_v16 = vsub.f32 1.0, %v1467_v10 }
0x1164   :  { %v1469_v27 = vmul.f32 %v1959_v23, %v1468_v16 }
0x1166   :  { %v1470_v29 = vadd.f32 %v1959_v23, %v1469_v27 }
0x1168   :  { %v1474_v26 = vsel %vm1473_vm7, %v1959_v23, %v1470_v29 }
0x1169   :  { %v2536_v42 = vsel %vm1476_vm8, %v1478_v32, %v1474_v26 }
0x116a   :  { %v1481_v34 = vmul.f32 2.0, %v2536_v42  ;;  %v1483_v0 = vmul.f32 %v2536_v42, %v2512_v59 }
0x116c   :  { %v1824_v50 = vadd.f32 -1.0, %v1481_v34 }
0x116e   :  { %1485 = vrot.lane.b32.xlu2 %v1824_v50, %s2065_s0 }
0x1178   :  { %v1397_v52 = vpop.f32.mrf.mxu3 }
0x1179   :  { %v1398_v43 = vadd.f32 %v2453_v44, %v1397_v52 }
0x117b   :  { %v1820_v53 = vmul.f32 -1.442695, %v1398_v43 }
0x117d   :  { %1960 = vpow2.f32 %v1820_v53 }
0x1183   :  { %v1961_v25 = vpop.eup %1960 }
0x1184   :  { %v1403_v54 = vadd.f32 1.0, %v1961_v25 }
0x1186   :  { %1962 = vrcp.f32 %v1403_v54  ;;  %v1415_v35 = vand.u32 2147483648, %v1403_v54  ;;  %v1413_v2 = vand.u32 2147483647, %v1403_v54  ;;  %vm1409_vm10 = vweird.f32 %v1403_v54 }
0x1188   :  { %v1416_v38 = vor.u32 1.1754944e-38, %v1415_v35  ;;  %vm1414_vm12 = vcmp.eq.f32.partialorder %v1413_v2, 8.507059e+37 }
0x118c   :  { %v1963_v55 = vpop.eup %1962 }
0x118d   :  { %v1405_v56 = vmul.f32 %v1963_v55, %v1403_v54  ;;  %vm1410_vm9 = vweird.f32 %v1963_v55 }
0x118e   :  { %vm1411_vm11 = vmor %vm1409_vm10, %vm1410_vm9 }
0x118f   :  { %v1406_v58 = vsub.f32 1.0, %v1405_v56 }
0x1191   :  { %v1407_v36 = vmul.f32 %v1963_v55, %v1406_v58 }
0x1193   :  { %v1408_v37 = vadd.f32 %v1963_v55, %v1407_v36 }
0x1195   :  { %v1412_v39 = vsel %vm1411_vm11, %v1963_v55, %v1408_v37 }
0x1196   :  { %v1417_v40 = vsel %vm1414_vm12, %v1416_v38, %v1412_v39 }
0x1197   :  { %v1419_v11 = vmul.f32 2.0, %v1417_v40  ;;  %v1421_v14 = vmul.f32 %v1417_v40, %v2517_v63 }
0x1199   :  { %v1821_v41 = vadd.f32 -1.0, %v1419_v11 }
0x119b   :  { %1423 = vrot.lane.b32.xlu1 %v1821_v41, %s2065_s0 }
0x11b4   :  { %v1328_v48 = vpop.f32.mrf.mxu1 }
0x11b5   :  { %v1329_v45 = vadd.f32 %v2501_v3, %v1328_v48 }
0x11b7   :  { %v1817_v30 = vmul.f32 -1.442695, %v1329_v45 }
0x11b9   :  { %1964 = vpow2.f32 %v1817_v30 }
0x11bf   :  { %v1965_v51 = vpop.eup %1964 }
0x11c0   :  { %v1334_v57 = vadd.f32 1.0, %v1965_v51 }
0x11c2   :  { %1966 = vrcp.f32 %v1334_v57  ;;  %v1346_v18 = vand.u32 2147483648, %v1334_v57  ;;  %v1344_v60 = vand.u32 2147483647, %v1334_v57  ;;  %vm1340_vm14 = vweird.f32 %v1334_v57 }
0x11c4   :  { %v1347_v20 = vor.u32 1.1754944e-38, %v1346_v18  ;;  %vm1345_vm0 = vcmp.eq.f32.partialorder %v1344_v60, 8.507059e+37 }
0x11c8   :  { %v1967_v61 = vpop.eup %1966  ;;  %v1486_v62 = vpop.permute.xlu2 %1485 }
0x11c9   :  { %v1336_v6 = vmul.f32 %v1967_v61, %v1334_v57  ;;  %v1488_v17 = vmul.f32 %v1486_v62, %v2536_v42  ;;  %vm1341_vm13 = vweird.f32 %v1967_v61 }
0x11ca   :  { %vm1342_vm15 = vmor %vm1340_vm14, %vm1341_vm13  ;;  %vm1744_vm14 = vcmask 1041408  }
0x11cb   :  { %v1337_v49 = vsub.f32 1.0, %v1336_v6  ;;  %1490 = vrot.lane.b32.xlu2 %v1488_v17, %s2066_s1 }
0x11cd   :  { %v1338_v19 = vmul.f32 %v1967_v61, %v1337_v49 }
0x11cf   :  { %v1339_v33 = vadd.f32 %v1967_v61, %v1338_v19 }
0x11d1   :  { %v1343_v21 = vsel %vm1342_vm15, %v1967_v61, %v1339_v33  ;;  %vm1753_vm15 = vcmask 1024  }
0x11d2   :  { %v1348_v46 = vsel %vm1345_vm0, %v1347_v20, %v1343_v21 }
0x11d3   :  { %v1350_v24 = vmul.f32 2.0, %v1348_v46  ;;  %v1352_v16 = vmul.f32 %v1348_v46, %v2522_v22 }
0x11d5   :  { %v1818_v31 = vadd.f32 -1.0, %v1350_v24 }
0x11d7   :  { %1354 = vrot.lane.b32.xlu0 %v1818_v31, %s2065_s0 }
0x120d   :  { %v1424_v1 = vpop.permute.xlu1 %1423 }
0x120e   :  { %v1426_v7 = vmul.f32 %v1424_v1, %v1417_v40 }
0x1210   :  { %1428 = vrot.lane.b32.xlu1 %v1426_v7, %s2066_s1 }
0x1225   :  { %v1491_v8 = vpop.permute.xlu2 %1490 }
0x1226   :  { %v1493_v9 = vadd.f32 %v1491_v8, %v1483_v0 }
0x1228   :  { %1968 = vtanh.f32 %v1493_v9 }
0x122e   :  { %v1969_v12 = vpop.eup %1968 }
0x122f   :  { %1496 = vrot.lane.b32.xlu2 %v1969_v12, %s2065_s0 }
0x1249   :  { %v1355_v13 = vpop.permute.xlu0 %1354 }
0x124a   :  { %v1357_v28 = vmul.f32 %v1355_v13, %v1348_v46 }
0x124c   :  { %1359 = vrot.lane.b32.xlu0 %v1357_v28, %s2066_s1 }
0x1282   :  { %v1429_v15 = vpop.permute.xlu1 %1428 }
0x1283   :  { %v2552_v4 = vadd.f32 %v1429_v15, %v1421_v14 }
0x1285   :  { %1970 = vtanh.f32 %v2552_v4 }
0x1289   :  { %v1497_v23 = vpop.permute.xlu2 %1496 }
0x128a   :  { %v1499_v59 = vmul.f32 %v1497_v23, %v2536_v42 }
0x128b   :  { %v1971_v10 = vpop.eup %1970 }
0x128c   :  { %1434 = vrot.lane.b32.xlu1 %v1971_v10, %s2065_s0  ;;  %1571 = vrot.lane.b32.xlu2 %v1499_v59, %s2066_s1 }
0x12be   :  { %v1360_v5 = vpop.permute.xlu0 %1359 }
0x12bf   :  { %v2559_v27 = vadd.f32 %v1360_v5, %v1352_v16 }
0x12c1   :  { %1972 = vtanh.f32 %v2559_v27 }
0x12c7   :  { %v1973_v63 = vpop.eup %1972 }
0x12c8   :  { %1365 = vrot.lane.b32.xlu0 %v1973_v63, %s2065_s0 }
0x12e6   :  { %v1572_v22 = vpop.permute.xlu2 %1571 }
0x12fe   :  { %v1435_v47 = vpop.permute.xlu1 %1434 }
0x12ff   :  { %v1437_v29 = vmul.f32 %v1435_v47, %v1417_v40 }
0x1301   :  { %1501 = vrot.lane.b32.xlu0 %v1437_v29, %s2066_s1 }
0x1309   :  { %1574 = vrot.lane.b32.xlu0 %v1437_v29, %s2065_s0 }
0x133a   :  { %v1366_v32 = vpop.permute.xlu0 %1365 }
0x133b   :  { %v1368_v26 = vmul.f32 %v1366_v32, %v1348_v46 }
0x133d   :  { %1505 = vrot.lane.b32.xlu1 %v1368_v26, %s2065_s0 }
0x1373   :  { %v1502_v42 = vpop.permute.xlu0 %1501 }
0x137b   :  { %v1575_v34 = vpop.permute.xlu0 %1574 }
0x137c   :  { %v1577_v50 = vsel %vm104_vm5, %v1572_v22, %v1575_v34 }
0x137d   :  { %1828 = vmatmul.msk.f32.vlgmr.msra.gmra.mxu0 %vm173_vm6, %v1577_v50 }
0x13af   :  { %v1506_v52 = vpop.permute.xlu1 %1505 }
0x13b0   :  { %v1508_v43 = vsel %vm104_vm5, %v1502_v42, %v1506_v52 }
0x13b1   :  { %1825 = vmatmul.msk.f32.vlgmr.msrb.gmra.mxu2 %vm173_vm6, %v1508_v43 }
0x13fa   :  { %v1598_v53 = vpop.f32.mrf.mxu0 }
0x13fb   :  { %v1599_v25 = vadd.f32 %v2453_v44, %v1598_v53 }
0x13fd   :  { %v1829_v54 = vmul.f32 -1.442695, %v1599_v25 }
0x13ff   :  { %1974 = vpow2.f32 %v1829_v54 }
0x1405   :  { %v1975_v55 = vpop.eup %1974 }
0x1406   :  { %v1604_v56 = vadd.f32 1.0, %v1975_v55 }
0x1408   :  { %1976 = vrcp.f32 %v1604_v56  ;;  %v1616_v2 = vand.u32 2147483648, %v1604_v56  ;;  %v1614_v38 = vand.u32 2147483647, %v1604_v56  ;;  %vm1610_vm2 = vweird.f32 %v1604_v56 }
0x140a   :  { %v1617_v40 = vor.u32 1.1754944e-38, %v1616_v2  ;;  %vm1615_vm4 = vcmp.eq.f32.partialorder %v1614_v38, 8.507059e+37 }
0x140e   :  { %v1977_v58 = vpop.eup %1976 }
0x140f   :  { %v1606_v35 = vmul.f32 %v1977_v58, %v1604_v56  ;;  %vm1611_vm1 = vweird.f32 %v1977_v58 }
0x1410   :  { %vm1612_vm3 = vmor %vm1610_vm2, %vm1611_vm1 }
0x1411   :  { %v1607_v36 = vsub.f32 1.0, %v1606_v35 }
0x1413   :  { %v1608_v37 = vmul.f32 %v1977_v58, %v1607_v36 }
0x1415   :  { %v1609_v39 = vadd.f32 %v1977_v58, %v1608_v37 }
0x1417   :  { %v1613_v11 = vsel %vm1612_vm3, %v1977_v58, %v1609_v39 }
0x1418   :  { %v1618_v41 = vsel %vm1615_vm4, %v1617_v40, %v1613_v11  ;;  %v1712_v40 = vld [vmem:[#allocation5 + $0xe0] sm:$0xff]  ;;  %v1711_v11 = vld [vmem:[#allocation5 + $0xd8] sm:$0xff] }
0x1419   :  { %v1620_v44 = vmul.f32 2.0, %v1618_v41  ;;  %v1622_v8 = vmul.f32 %v1618_v41, %v2552_v4  ;;  %1732 = vmatpush.msra.mxu3 %v1712_v40 }
0x141b   :  { %v1830_v48 = vadd.f32 -1.0, %v1620_v44  ;;  %1733 = vmatpush.msra.mxu3 %v1711_v11  ;;  %v1709_v44 = vld [vmem:[#allocation5 + $0xc8] sm:$0xff] }
0x141d   :  { %1624 = vrot.lane.b32.xlu2 %v1830_v48, %s2065_s0 }
0x1434   :  { %v1529_v45 = vpop.f32.mrf.mxu2 }
0x1435   :  { %v1530_v30 = vadd.f32 %v2501_v3, %v1529_v45 }
0x1437   :  { %v1826_v51 = vmul.f32 -1.442695, %v1530_v30 }
0x1439   :  { %1978 = vpow2.f32 %v1826_v51  ;;  %v1846_v51 = vld [vmem:[#allocation5 + $0xe8] ss:$0 sm:$0xff] }
0x143f   :  { %v1979_v57 = vpop.eup %1978 }
0x1440   :  { %v1535_v61 = vadd.f32 1.0, %v1979_v57 }
0x1442   :  { %1980 = vrcp.f32 %v1535_v61  ;;  %v1547_v49 = vand.u32 2147483648, %v1535_v61  ;;  %v1545_v19 = vand.u32 2147483647, %v1535_v61  ;;  %vm1541_vm8 = vweird.f32 %v1535_v61 }
0x1444   :  { %v1548_v33 = vor.u32 1.1754944e-38, %v1547_v49  ;;  %vm1546_vm10 = vcmp.eq.f32.partialorder %v1545_v19, 8.507059e+37 }
0x1448   :  { %v1981_v62 = vpop.eup %1980 }
0x1449   :  { %v1537_v6 = vmul.f32 %v1981_v62, %v1535_v61  ;;  %vm1542_vm7 = vweird.f32 %v1981_v62 }
0x144a   :  { %vm1543_vm9 = vmor %vm1541_vm8, %vm1542_vm7 }
0x144b   :  { %v1538_v17 = vsub.f32 1.0, %v1537_v6 }
0x144d   :  { %v1539_v18 = vmul.f32 %v1981_v62, %v1538_v17 }
0x144f   :  { %v1540_v60 = vadd.f32 %v1981_v62, %v1539_v18 }
0x1451   :  { %v1544_v20 = vsel %vm1543_vm9, %v1981_v62, %v1540_v60  ;;  %v1847_v62 = vld [vmem:[#allocation5 + $0xf0] ss:$0 sm:$0xff] }
0x1452   :  { %v1549_v21 = vsel %vm1546_vm10, %v1548_v33, %v1544_v20 }
0x1453   :  { %v1551_v46 = vmul.f32 2.0, %v1549_v21  ;;  %v1553_v28 = vmul.f32 %v1549_v21, %v2559_v27 }
0x1455   :  { %v1827_v24 = vadd.f32 -1.0, %v1551_v46 }
0x1457   :  { %1555 = vrot.lane.b32.xlu1 %v1827_v24, %s2065_s0 }
0x1477   :  { %v1625_v31 = vpop.permute.xlu2 %1624 }
0x1478   :  { %v1627_v1 = vmul.f32 %v1625_v31, %v1618_v41 }
0x147a   :  { %1629 = vrot.lane.b32.xlu1 %v1627_v1, %s2066_s1 }
0x14c9   :  { %v1556_v7 = vpop.permute.xlu1 %1555 }
0x14ca   :  { %v1558_v0 = vmul.f32 %v1556_v7, %v1549_v21 }
0x14cc   :  { %1560 = vrot.lane.b32.xlu0 %v1558_v0, %s2066_s1 }
0x14ec   :  { %v1630_v9 = vpop.permute.xlu1 %1629 }
0x14ed   :  { %v1632_v12 = vadd.f32 %v1630_v9, %v1622_v8 }
0x14ef   :  { %1982 = vtanh.f32 %v1632_v12 }
0x14f5   :  { %v1983_v13 = vpop.eup %1982 }
0x14f6   :  { %1635 = vrot.lane.b32.xlu0 %v1983_v13, %s2065_s0 }
0x153e   :  { %v1561_v14 = vpop.permute.xlu0 %1560 }
0x153f   :  { %v1563_v15 = vadd.f32 %v1561_v14, %v1553_v28 }
0x1541   :  { %1984 = vtanh.f32 %v1563_v15 }
0x1547   :  { %v1985_v23 = vpop.eup %1984 }
0x1548   :  { %1566 = vrot.lane.b32.xlu2 %v1985_v23, %s2065_s0 }
0x1568   :  { %v1636_v59 = vpop.permute.xlu0 %1635 }
0x1569   :  { %v1638_v10 = vmul.f32 %v1636_v59, %v1618_v41  ;;  %v1710_v41 = vld [vmem:[#allocation5 + $0xd0] sm:$0xff] }
0x156a   :  { %1734 = vmatpush.msra.mxu3 %v1710_v41 }
0x156b   :  { %1640 = vrot.lane.b32.xlu1 %v1638_v10, %s2066_s1 }
0x156c   :  { %1735 = vmatpush.msra.mxu3 %v1709_v44 }
0x15a2   :  { %v1567_v16 = vpop.permute.xlu2 %1566 }
0x15a3   :  { %v1569_v4 = vmul.f32 %v1567_v16, %v1549_v21 }
0x15a5   :  { %1644 = vrot.lane.b32.xlu2 %v1569_v4, %s2065_s0 }
0x15dd   :  { %v1641_v5 = vpop.permute.xlu1 %1640 }
0x15ff   :  { %v1645_v63 = vpop.permute.xlu2 %1644 }
0x1600   :  { %v1647_v47 = vsel %vm104_vm5, %v1641_v5, %v1645_v63 }
0x1601   :  { %1831 = vmatmul.msk.f32.vlgmr.msrb.gmra.mxu1 %vm173_vm6, %v1647_v47 }
0x167e   :  { %v1668_v27 = vpop.f32.mrf.mxu1 }
0x167f   :  { %v1669_v29 = vadd.f32 %v2501_v3, %v1668_v27 }
0x1681   :  { %v1832_v32 = vmul.f32 -1.442695, %v1669_v29 }
0x1683   :  { %1986 = vpow2.f32 %v1832_v32 }
0x1689   :  { %v1987_v26 = vpop.eup %1986 }
0x168a   :  { %v1674_v42 = vadd.f32 1.0, %v1987_v26 }
0x168c   :  { %1988 = vrcp.f32 %v1674_v42  ;;  %v1686_v52 = vand.u32 2147483648, %v1674_v42  ;;  %v1684_v53 = vand.u32 2147483647, %v1674_v42  ;;  %vm1680_vm12 = vweird.f32 %v1674_v42 }
0x168e   :  { %v1687_v54 = vor.u32 1.1754944e-38, %v1686_v52  ;;  %vm1685_vm6 = vcmp.eq.f32.partialorder %v1684_v53, 8.507059e+37 }
0x1692   :  { %v1989_v22 = vpop.eup %1988 }
0x1693   :  { %v1676_v34 = vmul.f32 %v1989_v22, %v1674_v42  ;;  %vm1681_vm11 = vweird.f32 %v1989_v22 }
0x1694   :  { %vm1682_vm13 = vmor %vm1680_vm12, %vm1681_vm11 }
0x1695   :  { %v1677_v50 = vsub.f32 1.0, %v1676_v34 }
0x1697   :  { %v1678_v43 = vmul.f32 %v1989_v22, %v1677_v50 }
0x1699   :  { %v1679_v25 = vadd.f32 %v1989_v22, %v1678_v43 }
0x169b   :  { %v1683_v55 = vsel %vm1682_vm13, %v1989_v22, %v1679_v25 }
0x169c   :  { %v1688_v56 = vsel %vm1685_vm6, %v1687_v54, %v1683_v55 }
0x169d   :  { %v1690_v3 = vmul.f32 2.0, %v1688_v56  ;;  %v1692_v2 = vmul.f32 %v1688_v56, %v1563_v15 }
0x169f   :  { %v1833_v58 = vadd.f32 -1.0, %v1690_v3 }
0x16a1   :  { %1694 = vrot.lane.b32.xlu0 %v1833_v58, %s2065_s0 }
0x1713   :  { %v1695_v35 = vpop.permute.xlu0 %1694 }
0x1714   :  { %v1697_v36 = vmul.f32 %v1695_v35, %v1688_v56 }
0x1716   :  { %1699 = vrot.lane.b32.xlu1 %v1697_v36, %s2066_s1 }
0x1788   :  { %v1700_v37 = vpop.permute.xlu1 %1699 }
0x1789   :  { %v1702_v38 = vadd.f32 %v1700_v37, %v1692_v2 }
0x178b   :  { %1990 = vtanh.f32 %v1702_v38 }
0x1791   :  { %v1991_v39 = vpop.eup %1990 }
0x1792   :  { %1705 = vrot.lane.b32.xlu2 %v1991_v39, %s2065_s0 }
0x17ec   :  { %v1706_v48 = vpop.permute.xlu2 %1705 }
0x17ed   :  { %v1708_v45 = vmul.f32 %v1706_v48, %v1688_v56 }
0x17ef   :  { %1716 = vrot.lane.b32.xlu0 %v1708_v45, %s2066_s1 }
0x1861   :  { %v1717_v30 = vpop.permute.xlu0 %1716 }
0x1862   :  { %1834 = vmatmul.msk.f32.vlgmr.msra.gmra.mxu3 %vm104_vm5, %v1717_v30 }
0x18e5   :  { %v1737_v57 = vpop.f32.mrf.mxu3 }
0x18e6   :  { %v1738_v61 = vadd.f32 %v1846_v51, %v1737_v57 }
0x18e8   :  { %1992 = vtanh.f32 %v1738_v61 }
0x18ee   :  { %v1993_v6 = vpop.eup %1992 }
0x18ef   :  { %v1743_v17 = vmul.f32 %v1993_v6, %v1847_v62 }
0x18f1   :  { %v1745_v49 = vsel %vm1744_vm14, %v1743_v17, 0.0 }
0x18f2   :  { %1746 = vadd.xlane.f32.xlu1 %v1745_v49 }
0x1965   :  { %v1747_v18 = vpop.xlane.xlu1 %1746 }
0x1966   :  { %v1748_v19 = vadd.f32 %v1847_v62, %v1747_v18 }
0x1968   :  { %1750 = vrot.lane.b32.xlu2 %v1748_v19, %s2067_s21 }
0x19c2   :  { %v1751_v60 = vpop.permute.xlu2 %1750 }
0x19c3   :  { %1754 = vst.msk [vmem:[%s2595_s2] sm:$0x3] %vm1753_vm15, %v1751_v60 }
0x19c4   :  { %1759 = vsyncpa [#allocation4], 1 }
0x19c5   :  { %1760 = vsyncpa [#allocation6], 1 }

</bundles_post_ra>
